<compile_context>
chip_gen: v5e
topology: v5e:2x2
jax: 0.10.0
libtpu: 0.0.40
codegen_flags: <defaults>
</compile_context>

<pallas_src>
import functools

import jax
import jax.numpy as jnp
from jax import lax
from jax.experimental import pallas as pl
from jax.experimental.pallas import tpu as pltpu


_EPS = 1e-5
_NEG_SLOPE = 0.01


def _leaky_relu(v):
    return jnp.where(v >= 0.0, v, _NEG_SLOPE * v)


def _in_scale_shift(pre, gamma, beta, count, eps):
    """InstanceNorm2d (biased variance) with folded affine: returns (scale, shift)
    such that  normalized = pre * scale + shift."""
    s = jnp.sum(pre, axis=0, keepdims=True)
    ss = jnp.sum(pre * pre, axis=0, keepdims=True)
    mu = s / count
    var = ss / count - mu * mu
    scale = gamma * lax.rsqrt(var + eps)
    shift = beta - mu * scale
    return scale, shift


def _bottleneck_kernel(xph_ref, w1_ref, g1_ref, b1_ref,
                       w2_ref, g2_ref, b2_ref,
                       w3_ref, g3_ref, b3_ref,
                       wsk_ref, gsk_ref, bsk_ref,
                       o_ref, y1pad_ref, *, Ho, Wo, eps):
    """One grid step = one batch sample.

    xph_ref : (1, 4, L, Cin)  stride-2 phase split of x, phase = 2*a + b  (row/col parity)
    y1pad_ref scratch : (4, Ho+1, Wo+1, Cb)  y1 phases with a zero pad row/col at index 0.
    """
    L = Ho * Wo
    Cin = w1_ref.shape[0]
    Cb = w1_ref.shape[1]
    Cout = w3_ref.shape[1]

    # ---- load x once: (4, L, Cin) -> (4L, Cin)  (phase merge is a no-op relayout)
    x_all = xph_ref[0].reshape(4 * L, Cin)

    # ---- conv1: 1x1 conv -> InstanceNorm -> LeakyReLU, all spatial positions in one matmul
    pre1 = jnp.dot(x_all, w1_ref[...], preferred_element_type=jnp.float32)   # (4L, Cb)
    sc1, sh1 = _in_scale_shift(pre1, g1_ref[...], b1_ref[...], 4.0 * L, eps)
    y1_all = _leaky_relu(pre1 * sc1 + sh1)                                   # (4L, Cb)

    # ---- scatter y1 phases into the zero-padded (top/left) VMEM buffer
    y1pad_ref[...] = jnp.zeros_like(y1pad_ref)
    for ph in range(4):
        y1pad_ref[ph, 1:Ho + 1, 1:Wo + 1, :] = (
            y1_all[ph * L:(ph + 1) * L].reshape(Ho, Wo, Cb))

    # ---- conv2: 3x3 stride-2 conv (pad=1) as 9 accumulated matmuls over phase slabs.
    # Tap (kh, kw) reads y1[2i+kh-1, 2j+kw-1]  ==  phase (a, b) slab shifted by (r0, c0).
    acc = jnp.zeros((L, Cb), jnp.float32)
    row_sel = ((1, 0), (0, 1), (1, 1))   # kh -> (row parity a, row offset r0)
    col_sel = ((1, 0), (0, 1), (1, 1))   # kw -> (col parity b, col offset c0)
    for kh in range(3):
        a, r0 = row_sel[kh]
        for kw in range(3):
            b, c0 = col_sel[kw]
            ph = a * 2 + b
            t = kh * 3 + kw
            slab = y1pad_ref[ph, r0:r0 + Ho, c0:c0 + Wo, :]                  # (Ho, Wo, Cb)
            w2k = w2_ref[t * Cb:(t + 1) * Cb, :]                             # (Cb, Cb)
            acc = acc + jnp.dot(slab.reshape(L, Cb), w2k,
                                preferred_element_type=jnp.float32)
    sc2, sh2 = _in_scale_shift(acc, g2_ref[...], b2_ref[...], float(L), eps)
    y2 = _leaky_relu(acc * sc2 + sh2)                                        # (L, Cb)

    # ---- skip: AvgPool2d(2,2) fused (mean of the 4 phases of x) -> 1x1 conv -> IN (no act)
    xpool = 0.25 * (x_all[0:L] + x_all[L:2 * L] +
                    x_all[2 * L:3 * L] + x_all[3 * L:4 * L])                 # (L, Cin)
    pres = jnp.dot(xpool, wsk_ref[...], preferred_element_type=jnp.float32)  # (L, Cout)
    scs, shs = _in_scale_shift(pres, gsk_ref[...], bsk_ref[...], float(L), eps)
    residual = pres * scs + shs

    # ---- conv3: 1x1 conv -> IN, add residual, final LeakyReLU
    pre3 = jnp.dot(y2, w3_ref[...], preferred_element_type=jnp.float32)      # (L, Cout)
    sc3, sh3 = _in_scale_shift(pre3, g3_ref[...], b3_ref[...], float(L), eps)
    out = _leaky_relu(pre3 * sc3 + sh3 + residual)
    o_ref[0] = out.astype(o_ref.dtype)


def bottleneck_d_forward(x_nchw, params):
    # layout: PyTorch NCHW in/out; kernel works on per-sample (L, C) blocks.
    x = jnp.transpose(x_nchw, (0, 2, 3, 1)).astype(jnp.float32)              # NHWC
    N, H, W, Cin = x.shape
    assert H % 2 == 0 and W % 2 == 0, "stride-2 path assumes even spatial dims"
    Ho, Wo = H // 2, W // 2
    L = Ho * Wo
    Cb = params["w1"].shape[1]
    Cout = params["w3"].shape[1]

    # Space-to-depth: phase (a, b) of the stride-2 grid -> leading axis (same bytes as x).
    # xph[n, 2a+b, p*Wo+q, c] = x[n, 2p+a, 2q+b, c]
    xph = (x.reshape(N, Ho, 2, Wo, 2, Cin)
             .transpose(0, 2, 4, 1, 3, 5)
             .reshape(N, 4, L, Cin))

    kernel = functools.partial(_bottleneck_kernel, Ho=Ho, Wo=Wo, eps=_EPS)

    param_bytes = sum(int(params[k].size) * 4 for k in params)
    flops = int(2 * N * L * (4 * Cin * Cb + 9 * Cb * Cb + Cb * Cout + Cin * Cout))
    bytes_accessed = int(N * 4 * L * Cin * 4 + param_bytes + N * L * Cout * 4)
    transcendentals = int(N * (2 * Cb + 2 * Cout))      # rsqrt per (stage, channel)

    out = pl.pallas_call(
        kernel,
        out_shape=jax.ShapeDtypeStruct((N, L, Cout), jnp.float32),
        grid=(N,),
        in_specs=[
            pl.BlockSpec((1, 4, L, Cin), lambda n: (n, 0, 0, 0)),
            pl.BlockSpec((Cin, Cb), lambda n: (0, 0)),
            pl.BlockSpec((1, Cb), lambda n: (0, 0)),
            pl.BlockSpec((1, Cb), lambda n: (0, 0)),
            pl.BlockSpec((9 * Cb, Cb), lambda n: (0, 0)),
            pl.BlockSpec((1, Cb), lambda n: (0, 0)),
            pl.BlockSpec((1, Cb), lambda n: (0, 0)),
            pl.BlockSpec((Cb, Cout), lambda n: (0, 0)),
            pl.BlockSpec((1, Cout), lambda n: (0, 0)),
            pl.BlockSpec((1, Cout), lambda n: (0, 0)),
            pl.BlockSpec((Cin, Cout), lambda n: (0, 0)),
            pl.BlockSpec((1, Cout), lambda n: (0, 0)),
            pl.BlockSpec((1, Cout), lambda n: (0, 0)),
        ],
        out_specs=pl.BlockSpec((1, L, Cout), lambda n: (n, 0, 0)),
        scratch_shapes=[pltpu.VMEM((4, Ho + 1, Wo + 1, Cb), jnp.float32)],
        compiler_params=pltpu.CompilerParams(
            dimension_semantics=("parallel",),
            vmem_limit_bytes=64 * 1024 * 1024),
        cost_estimate=pl.CostEstimate(
            flops=flops, transcendentals=transcendentals,
            bytes_accessed=bytes_accessed),
    )(xph, params["w1"], params["g1"], params["b1"],
      params["w2"], params["g2"], params["b2"],
      params["w3"], params["g3"], params["b3"],
      params["w_skip"], params["g_skip"], params["b_skip"])

    out = out.reshape(N, Ho, Wo, Cout)
    return jnp.transpose(out, (0, 3, 1, 2))                                  # back to NCHW


# -----------------------------------------------------------------------------
# Deterministic parameter construction (synthetic weights, no checkpoint).
# -----------------------------------------------------------------------------
def make_params(key, input_channels, bottleneck_channels, output_channels):
    k1, k2, k3, k4 = jax.random.split(key, 4)
    w2 = 0.1 * jax.random.normal(
        k2, (3, 3, bottleneck_channels, bottleneck_channels), jnp.float32)
    return {
        "w1": 0.1 * jax.random.normal(
            k1, (input_channels, bottleneck_channels), jnp.float32),
        "g1": jnp.ones((1, bottleneck_channels), jnp.float32),
        "b1": jnp.zeros((1, bottleneck_channels), jnp.float32),
        # (kh, kw, cin) flattened row-major -> rows t*Cb:(t+1)*Cb hold tap t = kh*3+kw.
        "w2": w2.reshape(9 * bottleneck_channels, bottleneck_channels),
        "g2": jnp.ones((1, bottleneck_channels), jnp.float32),
        "b2": jnp.zeros((1, bottleneck_channels), jnp.float32),
        "w3": 0.1 * jax.random.normal(
            k3, (bottleneck_channels, output_channels), jnp.float32),
        "g3": jnp.ones((1, output_channels), jnp.float32),
        "b3": jnp.zeros((1, output_channels), jnp.float32),
        "w_skip": 0.1 * jax.random.normal(
            k4, (input_channels, output_channels), jnp.float32),
        "g_skip": jnp.ones((1, output_channels), jnp.float32),
        "b_skip": jnp.zeros((1, output_channels), jnp.float32),
    }


if __name__ == "__main__":
    key = jax.random.PRNGKey(0)
    k_x, k_p = jax.random.split(key)

    # Small shapes consistent with the module: N=2, Cin=4, H=W=16,
    # bottleneck_channels=8, output_channels=16, kernel=3, stride=2.
    x = jax.random.normal(k_x, (2, 4, 16, 16), jnp.float32)                  # NCHW
    params = make_params(k_p, input_channels=4,
                         bottleneck_channels=8, output_channels=16)

    out = jax.jit(bottleneck_d_forward)(x, params)
    out = jax.block_until_ready(out)
    assert out.shape == (2, 16, 8, 8), out.shape                             # NCHW, stride-2
    assert jnp.all(jnp.isfinite(out))
    print("KERNEL_OK")
</pallas_src>

<mosaic_0001>
module attributes {stable_mosaic.version = 11 : i64} {
  func.func @_bottleneck_kernel(%arg0: i32, %arg1: memref<1x4x64x4xf32, #tpu.memory_space<vmem>>, %arg2: memref<4x8xf32, #tpu.memory_space<vmem>>, %arg3: memref<1x8xf32, #tpu.memory_space<vmem>>, %arg4: memref<1x8xf32, #tpu.memory_space<vmem>>, %arg5: memref<72x8xf32, #tpu.memory_space<vmem>>, %arg6: memref<1x8xf32, #tpu.memory_space<vmem>>, %arg7: memref<1x8xf32, #tpu.memory_space<vmem>>, %arg8: memref<8x16xf32, #tpu.memory_space<vmem>>, %arg9: memref<1x16xf32, #tpu.memory_space<vmem>>, %arg10: memref<1x16xf32, #tpu.memory_space<vmem>>, %arg11: memref<4x16xf32, #tpu.memory_space<vmem>>, %arg12: memref<1x16xf32, #tpu.memory_space<vmem>>, %arg13: memref<1x16xf32, #tpu.memory_space<vmem>>, %arg14: memref<1x64x16xf32, #tpu.memory_space<vmem>>, %arg15: memref<4x9x9x8xf32, #tpu.memory_space<vmem>>) attributes {dimension_semantics = [#tpu.dimension_semantics<parallel>], iteration_bounds = array<i64: 2>, scalar_prefetch = 0 : i64, scratch_operands = 1 : i64, tpu.core_type = #tpu.core_type<tc>, window_params = [{transform_indices = @transform_0, window_bounds = array<i64: 1, 4, 64, 4>}, {pipeline_mode = #tpu.pipeline_mode<synchronous>, transform_indices = @transform_1, window_bounds = array<i64: 4, 8>}, {pipeline_mode = #tpu.pipeline_mode<synchronous>, transform_indices = @transform_2, window_bounds = array<i64: 1, 8>}, {pipeline_mode = #tpu.pipeline_mode<synchronous>, transform_indices = @transform_3, window_bounds = array<i64: 1, 8>}, {pipeline_mode = #tpu.pipeline_mode<synchronous>, transform_indices = @transform_4, window_bounds = array<i64: 72, 8>}, {pipeline_mode = #tpu.pipeline_mode<synchronous>, transform_indices = @transform_5, window_bounds = array<i64: 1, 8>}, {pipeline_mode = #tpu.pipeline_mode<synchronous>, transform_indices = @transform_6, window_bounds = array<i64: 1, 8>}, {pipeline_mode = #tpu.pipeline_mode<synchronous>, transform_indices = @transform_7, window_bounds = array<i64: 8, 16>}, {pipeline_mode = #tpu.pipeline_mode<synchronous>, transform_indices = @transform_8, window_bounds = array<i64: 1, 16>}, {pipeline_mode = #tpu.pipeline_mode<synchronous>, transform_indices = @transform_9, window_bounds = array<i64: 1, 16>}, {pipeline_mode = #tpu.pipeline_mode<synchronous>, transform_indices = @transform_10, window_bounds = array<i64: 4, 16>}, {pipeline_mode = #tpu.pipeline_mode<synchronous>, transform_indices = @transform_11, window_bounds = array<i64: 1, 16>}, {pipeline_mode = #tpu.pipeline_mode<synchronous>, transform_indices = @transform_12, window_bounds = array<i64: 1, 16>}, {transform_indices = @transform_13, window_bounds = array<i64: 1, 64, 16>}]} {
    %c0 = arith.constant 0 : index
    %c0_0 = arith.constant 0 : index
    %c0_1 = arith.constant 0 : index
    %c0_2 = arith.constant 0 : index
    %0 = vector.load %arg1[%c0, %c0_0, %c0_1, %c0_2] : memref<1x4x64x4xf32, #tpu.memory_space<vmem>>, vector<1x4x64x4xf32>
    %1 = vector.shape_cast %0 : vector<1x4x64x4xf32> to vector<4x64x4xf32>
    %2 = vector.shape_cast %1 : vector<4x64x4xf32> to vector<256x4xf32>
    %c0_3 = arith.constant 0 : index
    %c0_4 = arith.constant 0 : index
    %3 = vector.load %arg2[%c0_3, %c0_4] : memref<4x8xf32, #tpu.memory_space<vmem>>, vector<4x8xf32>
    %cst = arith.constant dense<0.000000e+00> : vector<256x8xf32>
    %4 = tpu.matmul %2, %3, %cst {dimension_numbers = #tpu.dot_dimension_numbers<[1], [0], [0], [1], [0, 0, 1, 1], [], []>} : vector<256x4xf32>, vector<4x8xf32>, vector<256x8xf32> -> vector<256x8xf32>
    %c0_5 = arith.constant 0 : index
    %c0_6 = arith.constant 0 : index
    %5 = vector.load %arg3[%c0_5, %c0_6] : memref<1x8xf32, #tpu.memory_space<vmem>>, vector<1x8xf32>
    %c0_7 = arith.constant 0 : index
    %c0_8 = arith.constant 0 : index
    %6 = vector.load %arg4[%c0_7, %c0_8] : memref<1x8xf32, #tpu.memory_space<vmem>>, vector<1x8xf32>
    %cst_9 = arith.constant dense<0.000000e+00> : vector<8xf32>
    %7 = vector.multi_reduction <add>, %4, %cst_9 [0] : vector<256x8xf32> to vector<8xf32>
    %8 = vector.shape_cast %7 : vector<8xf32> to vector<1x8xf32>
    %9 = arith.mulf %4, %4 : vector<256x8xf32>
    %cst_10 = arith.constant dense<0.000000e+00> : vector<8xf32>
    %10 = vector.multi_reduction <add>, %9, %cst_10 [0] : vector<256x8xf32> to vector<8xf32>
    %11 = vector.shape_cast %10 : vector<8xf32> to vector<1x8xf32>
    %cst_11 = arith.constant 2.560000e+02 : f32
    %12 = vector.broadcast %cst_11 : f32 to vector<1x8xf32>
    %13 = arith.divf %8, %12 : vector<1x8xf32>
    %cst_12 = arith.constant 2.560000e+02 : f32
    %14 = vector.broadcast %cst_12 : f32 to vector<1x8xf32>
    %15 = arith.divf %11, %14 : vector<1x8xf32>
    %16 = arith.mulf %13, %13 : vector<1x8xf32>
    %17 = arith.subf %15, %16 : vector<1x8xf32>
    %cst_13 = arith.constant 9.99999974E-6 : f32
    %18 = vector.broadcast %cst_13 : f32 to vector<1x8xf32>
    %19 = arith.addf %17, %18 : vector<1x8xf32>
    %20 = math.rsqrt %19 : vector<1x8xf32>
    %21 = arith.mulf %5, %20 : vector<1x8xf32>
    %22 = arith.mulf %13, %21 : vector<1x8xf32>
    %23 = arith.subf %6, %22 : vector<1x8xf32>
    %24 = vector.broadcast %21 : vector<1x8xf32> to vector<256x8xf32>
    %25 = arith.mulf %4, %24 : vector<256x8xf32>
    %26 = vector.broadcast %23 : vector<1x8xf32> to vector<256x8xf32>
    %27 = arith.addf %25, %26 : vector<256x8xf32>
    %cst_14 = arith.constant 0.000000e+00 : f32
    %28 = vector.broadcast %cst_14 : f32 to vector<256x8xf32>
    %29 = arith.cmpf oge, %27, %28 : vector<256x8xf32>
    %cst_15 = arith.constant 0.00999999977 : f32
    %30 = vector.broadcast %cst_15 : f32 to vector<256x8xf32>
    %31 = arith.mulf %30, %27 : vector<256x8xf32>
    %32 = arith.select %29, %27, %31 : vector<256x8xi1>, vector<256x8xf32>
    %cst_16 = arith.constant 0.000000e+00 : f32
    %33 = vector.broadcast %cst_16 : f32 to vector<4x9x9x8xf32>
    %c0_17 = arith.constant 0 : index
    %c0_18 = arith.constant 0 : index
    %c0_19 = arith.constant 0 : index
    %c0_20 = arith.constant 0 : index
    %34 = vector.load %arg15[%c0_17, %c0_18, %c0_19, %c0_20] : memref<4x9x9x8xf32, #tpu.memory_space<vmem>>, vector<4x9x9x8xf32>
    tpu.vector_store %arg15[%c0_17, %c0_18, %c0_19, %c0_20], %33 {strides = array<i32>} : memref<4x9x9x8xf32, #tpu.memory_space<vmem>>, vector<4x9x9x8xf32>,
    %35 = vector.extract_strided_slice %32 {offsets = [0, 0], sizes = [64, 8], strides = [1, 1]} : vector<256x8xf32> to vector<64x8xf32>
    %36 = vector.shape_cast %35 : vector<64x8xf32> to vector<8x8x8xf32>
    %c0_21 = arith.constant 0 : index
    %c1 = arith.constant 1 : index
    %c1_22 = arith.constant 1 : index
    %c0_23 = arith.constant 0 : index
    %37 = vector.load %arg15[%c0_21, %c1, %c1_22, %c0_23] : memref<4x9x9x8xf32, #tpu.memory_space<vmem>>, vector<1x8x8x8xf32>
    %38 = vector.shape_cast %37 : vector<1x8x8x8xf32> to vector<8x8x8xf32>
    %39 = vector.shape_cast %36 : vector<8x8x8xf32> to vector<1x8x8x8xf32>
    tpu.vector_store %arg15[%c0_21, %c1, %c1_22, %c0_23], %39 {strides = array<i32>} : memref<4x9x9x8xf32, #tpu.memory_space<vmem>>, vector<1x8x8x8xf32>,
    %40 = vector.extract_strided_slice %32 {offsets = [64, 0], sizes = [64, 8], strides = [1, 1]} : vector<256x8xf32> to vector<64x8xf32>
    %41 = vector.shape_cast %40 : vector<64x8xf32> to vector<8x8x8xf32>
    %c1_24 = arith.constant 1 : index
    %c1_25 = arith.constant 1 : index
    %c1_26 = arith.constant 1 : index
    %c0_27 = arith.constant 0 : index
    %42 = vector.load %arg15[%c1_24, %c1_25, %c1_26, %c0_27] : memref<4x9x9x8xf32, #tpu.memory_space<vmem>>, vector<1x8x8x8xf32>
    %43 = vector.shape_cast %42 : vector<1x8x8x8xf32> to vector<8x8x8xf32>
    %44 = vector.shape_cast %41 : vector<8x8x8xf32> to vector<1x8x8x8xf32>
    tpu.vector_store %arg15[%c1_24, %c1_25, %c1_26, %c0_27], %44 {strides = array<i32>} : memref<4x9x9x8xf32, #tpu.memory_space<vmem>>, vector<1x8x8x8xf32>,
    %45 = vector.extract_strided_slice %32 {offsets = [128, 0], sizes = [64, 8], strides = [1, 1]} : vector<256x8xf32> to vector<64x8xf32>
    %46 = vector.shape_cast %45 : vector<64x8xf32> to vector<8x8x8xf32>
    %c2 = arith.constant 2 : index
    %c1_28 = arith.constant 1 : index
    %c1_29 = arith.constant 1 : index
    %c0_30 = arith.constant 0 : index
    %47 = vector.load %arg15[%c2, %c1_28, %c1_29, %c0_30] : memref<4x9x9x8xf32, #tpu.memory_space<vmem>>, vector<1x8x8x8xf32>
    %48 = vector.shape_cast %47 : vector<1x8x8x8xf32> to vector<8x8x8xf32>
    %49 = vector.shape_cast %46 : vector<8x8x8xf32> to vector<1x8x8x8xf32>
    tpu.vector_store %arg15[%c2, %c1_28, %c1_29, %c0_30], %49 {strides = array<i32>} : memref<4x9x9x8xf32, #tpu.memory_space<vmem>>, vector<1x8x8x8xf32>,
    %50 = vector.extract_strided_slice %32 {offsets = [192, 0], sizes = [64, 8], strides = [1, 1]} : vector<256x8xf32> to vector<64x8xf32>
    %51 = vector.shape_cast %50 : vector<64x8xf32> to vector<8x8x8xf32>
    %c3 = arith.constant 3 : index
    %c1_31 = arith.constant 1 : index
    %c1_32 = arith.constant 1 : index
    %c0_33 = arith.constant 0 : index
    %52 = vector.load %arg15[%c3, %c1_31, %c1_32, %c0_33] : memref<4x9x9x8xf32, #tpu.memory_space<vmem>>, vector<1x8x8x8xf32>
    %53 = vector.shape_cast %52 : vector<1x8x8x8xf32> to vector<8x8x8xf32>
    %54 = vector.shape_cast %51 : vector<8x8x8xf32> to vector<1x8x8x8xf32>
    tpu.vector_store %arg15[%c3, %c1_31, %c1_32, %c0_33], %54 {strides = array<i32>} : memref<4x9x9x8xf32, #tpu.memory_space<vmem>>, vector<1x8x8x8xf32>,
    %cst_34 = arith.constant 0.000000e+00 : f32
    %55 = vector.broadcast %cst_34 : f32 to vector<64x8xf32>
    %c3_35 = arith.constant 3 : index
    %c0_36 = arith.constant 0 : index
    %c0_37 = arith.constant 0 : index
    %c0_38 = arith.constant 0 : index
    %56 = vector.load %arg15[%c3_35, %c0_36, %c0_37, %c0_38] : memref<4x9x9x8xf32, #tpu.memory_space<vmem>>, vector<1x8x8x8xf32>
    %57 = vector.shape_cast %56 : vector<1x8x8x8xf32> to vector<8x8x8xf32>
    %c0_39 = arith.constant 0 : index
    %c0_40 = arith.constant 0 : index
    %58 = vector.load %arg5[%c0_39, %c0_40] : memref<72x8xf32, #tpu.memory_space<vmem>>, vector<8x8xf32>
    %59 = vector.shape_cast %57 : vector<8x8x8xf32> to vector<64x8xf32>
    %cst_41 = arith.constant dense<0.000000e+00> : vector<64x8xf32>
    %60 = tpu.matmul %59, %58, %cst_41 {dimension_numbers = #tpu.dot_dimension_numbers<[1], [0], [0], [1], [0, 0, 1, 1], [], []>} : vector<64x8xf32>, vector<8x8xf32>, vector<64x8xf32> -> vector<64x8xf32>
    %61 = arith.addf %55, %60 : vector<64x8xf32>
    %c2_42 = arith.constant 2 : index
    %c0_43 = arith.constant 0 : index
    %c1_44 = arith.constant 1 : index
    %c0_45 = arith.constant 0 : index
    %62 = vector.load %arg15[%c2_42, %c0_43, %c1_44, %c0_45] : memref<4x9x9x8xf32, #tpu.memory_space<vmem>>, vector<1x8x8x8xf32>
    %63 = vector.shape_cast %62 : vector<1x8x8x8xf32> to vector<8x8x8xf32>
    %c8 = arith.constant 8 : index
    %c0_46 = arith.constant 0 : index
    %64 = vector.load %arg5[%c8, %c0_46] : memref<72x8xf32, #tpu.memory_space<vmem>>, vector<8x8xf32>
    %65 = vector.shape_cast %63 : vector<8x8x8xf32> to vector<64x8xf32>
    %cst_47 = arith.constant dense<0.000000e+00> : vector<64x8xf32>
    %66 = tpu.matmul %65, %64, %cst_47 {dimension_numbers = #tpu.dot_dimension_numbers<[1], [0], [0], [1], [0, 0, 1, 1], [], []>} : vector<64x8xf32>, vector<8x8xf32>, vector<64x8xf32> -> vector<64x8xf32>
    %67 = arith.addf %61, %66 : vector<64x8xf32>
    %c3_48 = arith.constant 3 : index
    %c0_49 = arith.constant 0 : index
    %c1_50 = arith.constant 1 : index
    %c0_51 = arith.constant 0 : index
    %68 = vector.load %arg15[%c3_48, %c0_49, %c1_50, %c0_51] : memref<4x9x9x8xf32, #tpu.memory_space<vmem>>, vector<1x8x8x8xf32>
    %69 = vector.shape_cast %68 : vector<1x8x8x8xf32> to vector<8x8x8xf32>
    %c16 = arith.constant 16 : index
    %c0_52 = arith.constant 0 : index
    %70 = vector.load %arg5[%c16, %c0_52] : memref<72x8xf32, #tpu.memory_space<vmem>>, vector<8x8xf32>
    %71 = vector.shape_cast %69 : vector<8x8x8xf32> to vector<64x8xf32>
    %cst_53 = arith.constant dense<0.000000e+00> : vector<64x8xf32>
    %72 = tpu.matmul %71, %70, %cst_53 {dimension_numbers = #tpu.dot_dimension_numbers<[1], [0], [0], [1], [0, 0, 1, 1], [], []>} : vector<64x8xf32>, vector<8x8xf32>, vector<64x8xf32> -> vector<64x8xf32>
    %73 = arith.addf %67, %72 : vector<64x8xf32>
    %c1_54 = arith.constant 1 : index
    %c1_55 = arith.constant 1 : index
    %c0_56 = arith.constant 0 : index
    %c0_57 = arith.constant 0 : index
    %74 = vector.load %arg15[%c1_54, %c1_55, %c0_56, %c0_57] : memref<4x9x9x8xf32, #tpu.memory_space<vmem>>, vector<1x8x8x8xf32>
    %75 = vector.shape_cast %74 : vector<1x8x8x8xf32> to vector<8x8x8xf32>
    %c24 = arith.constant 24 : index
    %c0_58 = arith.constant 0 : index
    %76 = vector.load %arg5[%c24, %c0_58] : memref<72x8xf32, #tpu.memory_space<vmem>>, vector<8x8xf32>
    %77 = vector.shape_cast %75 : vector<8x8x8xf32> to vector<64x8xf32>
    %cst_59 = arith.constant dense<0.000000e+00> : vector<64x8xf32>
    %78 = tpu.matmul %77, %76, %cst_59 {dimension_numbers = #tpu.dot_dimension_numbers<[1], [0], [0], [1], [0, 0, 1, 1], [], []>} : vector<64x8xf32>, vector<8x8xf32>, vector<64x8xf32> -> vector<64x8xf32>
    %79 = arith.addf %73, %78 : vector<64x8xf32>
    %c0_60 = arith.constant 0 : index
    %c1_61 = arith.constant 1 : index
    %c1_62 = arith.constant 1 : index
    %c0_63 = arith.constant 0 : index
    %80 = vector.load %arg15[%c0_60, %c1_61, %c1_62, %c0_63] : memref<4x9x9x8xf32, #tpu.memory_space<vmem>>, vector<1x8x8x8xf32>
    %81 = vector.shape_cast %80 : vector<1x8x8x8xf32> to vector<8x8x8xf32>
    %c32 = arith.constant 32 : index
    %c0_64 = arith.constant 0 : index
    %82 = vector.load %arg5[%c32, %c0_64] : memref<72x8xf32, #tpu.memory_space<vmem>>, vector<8x8xf32>
    %83 = vector.shape_cast %81 : vector<8x8x8xf32> to vector<64x8xf32>
    %cst_65 = arith.constant dense<0.000000e+00> : vector<64x8xf32>
    %84 = tpu.matmul %83, %82, %cst_65 {dimension_numbers = #tpu.dot_dimension_numbers<[1], [0], [0], [1], [0, 0, 1, 1], [], []>} : vector<64x8xf32>, vector<8x8xf32>, vector<64x8xf32> -> vector<64x8xf32>
    %85 = arith.addf %79, %84 : vector<64x8xf32>
    %c1_66 = arith.constant 1 : index
    %c1_67 = arith.constant 1 : index
    %c1_68 = arith.constant 1 : index
    %c0_69 = arith.constant 0 : index
    %86 = vector.load %arg15[%c1_66, %c1_67, %c1_68, %c0_69] : memref<4x9x9x8xf32, #tpu.memory_space<vmem>>, vector<1x8x8x8xf32>
    %87 = vector.shape_cast %86 : vector<1x8x8x8xf32> to vector<8x8x8xf32>
    %c40 = arith.constant 40 : index
    %c0_70 = arith.constant 0 : index
    %88 = vector.load %arg5[%c40, %c0_70] : memref<72x8xf32, #tpu.memory_space<vmem>>, vector<8x8xf32>
    %89 = vector.shape_cast %87 : vector<8x8x8xf32> to vector<64x8xf32>
    %cst_71 = arith.constant dense<0.000000e+00> : vector<64x8xf32>
    %90 = tpu.matmul %89, %88, %cst_71 {dimension_numbers = #tpu.dot_dimension_numbers<[1], [0], [0], [1], [0, 0, 1, 1], [], []>} : vector<64x8xf32>, vector<8x8xf32>, vector<64x8xf32> -> vector<64x8xf32>
    %91 = arith.addf %85, %90 : vector<64x8xf32>
    %c3_72 = arith.constant 3 : index
    %c1_73 = arith.constant 1 : index
    %c0_74 = arith.constant 0 : index
    %c0_75 = arith.constant 0 : index
    %92 = vector.load %arg15[%c3_72, %c1_73, %c0_74, %c0_75] : memref<4x9x9x8xf32, #tpu.memory_space<vmem>>, vector<1x8x8x8xf32>
    %93 = vector.shape_cast %92 : vector<1x8x8x8xf32> to vector<8x8x8xf32>
    %c48 = arith.constant 48 : index
    %c0_76 = arith.constant 0 : index
    %94 = vector.load %arg5[%c48, %c0_76] : memref<72x8xf32, #tpu.memory_space<vmem>>, vector<8x8xf32>
    %95 = vector.shape_cast %93 : vector<8x8x8xf32> to vector<64x8xf32>
    %cst_77 = arith.constant dense<0.000000e+00> : vector<64x8xf32>
    %96 = tpu.matmul %95, %94, %cst_77 {dimension_numbers = #tpu.dot_dimension_numbers<[1], [0], [0], [1], [0, 0, 1, 1], [], []>} : vector<64x8xf32>, vector<8x8xf32>, vector<64x8xf32> -> vector<64x8xf32>
    %97 = arith.addf %91, %96 : vector<64x8xf32>
    %c2_78 = arith.constant 2 : index
    %c1_79 = arith.constant 1 : index
    %c1_80 = arith.constant 1 : index
    %c0_81 = arith.constant 0 : index
    %98 = vector.load %arg15[%c2_78, %c1_79, %c1_80, %c0_81] : memref<4x9x9x8xf32, #tpu.memory_space<vmem>>, vector<1x8x8x8xf32>
    %99 = vector.shape_cast %98 : vector<1x8x8x8xf32> to vector<8x8x8xf32>
    %c56 = arith.constant 56 : index
    %c0_82 = arith.constant 0 : index
    %100 = vector.load %arg5[%c56, %c0_82] : memref<72x8xf32, #tpu.memory_space<vmem>>, vector<8x8xf32>
    %101 = vector.shape_cast %99 : vector<8x8x8xf32> to vector<64x8xf32>
    %cst_83 = arith.constant dense<0.000000e+00> : vector<64x8xf32>
    %102 = tpu.matmul %101, %100, %cst_83 {dimension_numbers = #tpu.dot_dimension_numbers<[1], [0], [0], [1], [0, 0, 1, 1], [], []>} : vector<64x8xf32>, vector<8x8xf32>, vector<64x8xf32> -> vector<64x8xf32>
    %103 = arith.addf %97, %102 : vector<64x8xf32>
    %c3_84 = arith.constant 3 : index
    %c1_85 = arith.constant 1 : index
    %c1_86 = arith.constant 1 : index
    %c0_87 = arith.constant 0 : index
    %104 = vector.load %arg15[%c3_84, %c1_85, %c1_86, %c0_87] : memref<4x9x9x8xf32, #tpu.memory_space<vmem>>, vector<1x8x8x8xf32>
    %105 = vector.shape_cast %104 : vector<1x8x8x8xf32> to vector<8x8x8xf32>
    %c64 = arith.constant 64 : index
    %c0_88 = arith.constant 0 : index
    %106 = vector.load %arg5[%c64, %c0_88] : memref<72x8xf32, #tpu.memory_space<vmem>>, vector<8x8xf32>
    %107 = vector.shape_cast %105 : vector<8x8x8xf32> to vector<64x8xf32>
    %cst_89 = arith.constant dense<0.000000e+00> : vector<64x8xf32>
    %108 = tpu.matmul %107, %106, %cst_89 {dimension_numbers = #tpu.dot_dimension_numbers<[1], [0], [0], [1], [0, 0, 1, 1], [], []>} : vector<64x8xf32>, vector<8x8xf32>, vector<64x8xf32> -> vector<64x8xf32>
    %109 = arith.addf %103, %108 : vector<64x8xf32>
    %c0_90 = arith.constant 0 : index
    %c0_91 = arith.constant 0 : index
    %110 = vector.load %arg6[%c0_90, %c0_91] : memref<1x8xf32, #tpu.memory_space<vmem>>, vector<1x8xf32>
    %c0_92 = arith.constant 0 : index
    %c0_93 = arith.constant 0 : index
    %111 = vector.load %arg7[%c0_92, %c0_93] : memref<1x8xf32, #tpu.memory_space<vmem>>, vector<1x8xf32>
    %cst_94 = arith.constant dense<0.000000e+00> : vector<8xf32>
    %112 = vector.multi_reduction <add>, %109, %cst_94 [0] : vector<64x8xf32> to vector<8xf32>
    %113 = vector.shape_cast %112 : vector<8xf32> to vector<1x8xf32>
    %114 = arith.mulf %109, %109 : vector<64x8xf32>
    %cst_95 = arith.constant dense<0.000000e+00> : vector<8xf32>
    %115 = vector.multi_reduction <add>, %114, %cst_95 [0] : vector<64x8xf32> to vector<8xf32>
    %116 = vector.shape_cast %115 : vector<8xf32> to vector<1x8xf32>
    %cst_96 = arith.constant 6.400000e+01 : f32
    %117 = vector.broadcast %cst_96 : f32 to vector<1x8xf32>
    %118 = arith.divf %113, %117 : vector<1x8xf32>
    %cst_97 = arith.constant 6.400000e+01 : f32
    %119 = vector.broadcast %cst_97 : f32 to vector<1x8xf32>
    %120 = arith.divf %116, %119 : vector<1x8xf32>
    %121 = arith.mulf %118, %118 : vector<1x8xf32>
    %122 = arith.subf %120, %121 : vector<1x8xf32>
    %cst_98 = arith.constant 9.99999974E-6 : f32
    %123 = vector.broadcast %cst_98 : f32 to vector<1x8xf32>
    %124 = arith.addf %122, %123 : vector<1x8xf32>
    %125 = math.rsqrt %124 : vector<1x8xf32>
    %126 = arith.mulf %110, %125 : vector<1x8xf32>
    %127 = arith.mulf %118, %126 : vector<1x8xf32>
    %128 = arith.subf %111, %127 : vector<1x8xf32>
    %129 = vector.broadcast %126 : vector<1x8xf32> to vector<64x8xf32>
    %130 = arith.mulf %109, %129 : vector<64x8xf32>
    %131 = vector.broadcast %128 : vector<1x8xf32> to vector<64x8xf32>
    %132 = arith.addf %130, %131 : vector<64x8xf32>
    %cst_99 = arith.constant 0.000000e+00 : f32
    %133 = vector.broadcast %cst_99 : f32 to vector<64x8xf32>
    %134 = arith.cmpf oge, %132, %133 : vector<64x8xf32>
    %cst_100 = arith.constant 0.00999999977 : f32
    %135 = vector.broadcast %cst_100 : f32 to vector<64x8xf32>
    %136 = arith.mulf %135, %132 : vector<64x8xf32>
    %137 = arith.select %134, %132, %136 : vector<64x8xi1>, vector<64x8xf32>
    %138 = vector.extract_strided_slice %2 {offsets = [0, 0], sizes = [64, 4], strides = [1, 1]} : vector<256x4xf32> to vector<64x4xf32>
    %139 = vector.extract_strided_slice %2 {offsets = [64, 0], sizes = [64, 4], strides = [1, 1]} : vector<256x4xf32> to vector<64x4xf32>
    %140 = arith.addf %138, %139 : vector<64x4xf32>
    %141 = vector.extract_strided_slice %2 {offsets = [128, 0], sizes = [64, 4], strides = [1, 1]} : vector<256x4xf32> to vector<64x4xf32>
    %142 = arith.addf %140, %141 : vector<64x4xf32>
    %143 = vector.extract_strided_slice %2 {offsets = [192, 0], sizes = [64, 4], strides = [1, 1]} : vector<256x4xf32> to vector<64x4xf32>
    %144 = arith.addf %142, %143 : vector<64x4xf32>
    %cst_101 = arith.constant 2.500000e-01 : f32
    %145 = vector.broadcast %cst_101 : f32 to vector<64x4xf32>
    %146 = arith.mulf %145, %144 : vector<64x4xf32>
    %c0_102 = arith.constant 0 : index
    %c0_103 = arith.constant 0 : index
    %147 = vector.load %arg11[%c0_102, %c0_103] : memref<4x16xf32, #tpu.memory_space<vmem>>, vector<4x16xf32>
    %cst_104 = arith.constant dense<0.000000e+00> : vector<64x16xf32>
    %148 = tpu.matmul %146, %147, %cst_104 {dimension_numbers = #tpu.dot_dimension_numbers<[1], [0], [0], [1], [0, 0, 1, 1], [], []>} : vector<64x4xf32>, vector<4x16xf32>, vector<64x16xf32> -> vector<64x16xf32>
    %c0_105 = arith.constant 0 : index
    %c0_106 = arith.constant 0 : index
    %149 = vector.load %arg12[%c0_105, %c0_106] : memref<1x16xf32, #tpu.memory_space<vmem>>, vector<1x16xf32>
    %c0_107 = arith.constant 0 : index
    %c0_108 = arith.constant 0 : index
    %150 = vector.load %arg13[%c0_107, %c0_108] : memref<1x16xf32, #tpu.memory_space<vmem>>, vector<1x16xf32>
    %cst_109 = arith.constant dense<0.000000e+00> : vector<16xf32>
    %151 = vector.multi_reduction <add>, %148, %cst_109 [0] : vector<64x16xf32> to vector<16xf32>
    %152 = vector.shape_cast %151 : vector<16xf32> to vector<1x16xf32>
    %153 = arith.mulf %148, %148 : vector<64x16xf32>
    %cst_110 = arith.constant dense<0.000000e+00> : vector<16xf32>
    %154 = vector.multi_reduction <add>, %153, %cst_110 [0] : vector<64x16xf32> to vector<16xf32>
    %155 = vector.shape_cast %154 : vector<16xf32> to vector<1x16xf32>
    %cst_111 = arith.constant 6.400000e+01 : f32
    %156 = vector.broadcast %cst_111 : f32 to vector<1x16xf32>
    %157 = arith.divf %152, %156 : vector<1x16xf32>
    %cst_112 = arith.constant 6.400000e+01 : f32
    %158 = vector.broadcast %cst_112 : f32 to vector<1x16xf32>
    %159 = arith.divf %155, %158 : vector<1x16xf32>
    %160 = arith.mulf %157, %157 : vector<1x16xf32>
    %161 = arith.subf %159, %160 : vector<1x16xf32>
    %cst_113 = arith.constant 9.99999974E-6 : f32
    %162 = vector.broadcast %cst_113 : f32 to vector<1x16xf32>
    %163 = arith.addf %161, %162 : vector<1x16xf32>
    %164 = math.rsqrt %163 : vector<1x16xf32>
    %165 = arith.mulf %149, %164 : vector<1x16xf32>
    %166 = arith.mulf %157, %165 : vector<1x16xf32>
    %167 = arith.subf %150, %166 : vector<1x16xf32>
    %168 = vector.broadcast %165 : vector<1x16xf32> to vector<64x16xf32>
    %169 = arith.mulf %148, %168 : vector<64x16xf32>
    %170 = vector.broadcast %167 : vector<1x16xf32> to vector<64x16xf32>
    %171 = arith.addf %169, %170 : vector<64x16xf32>
    %c0_114 = arith.constant 0 : index
    %c0_115 = arith.constant 0 : index
    %172 = vector.load %arg8[%c0_114, %c0_115] : memref<8x16xf32, #tpu.memory_space<vmem>>, vector<8x16xf32>
    %cst_116 = arith.constant dense<0.000000e+00> : vector<64x16xf32>
    %173 = tpu.matmul %137, %172, %cst_116 {dimension_numbers = #tpu.dot_dimension_numbers<[1], [0], [0], [1], [0, 0, 1, 1], [], []>} : vector<64x8xf32>, vector<8x16xf32>, vector<64x16xf32> -> vector<64x16xf32>
    %c0_117 = arith.constant 0 : index
    %c0_118 = arith.constant 0 : index
    %174 = vector.load %arg9[%c0_117, %c0_118] : memref<1x16xf32, #tpu.memory_space<vmem>>, vector<1x16xf32>
    %c0_119 = arith.constant 0 : index
    %c0_120 = arith.constant 0 : index
    %175 = vector.load %arg10[%c0_119, %c0_120] : memref<1x16xf32, #tpu.memory_space<vmem>>, vector<1x16xf32>
    %cst_121 = arith.constant dense<0.000000e+00> : vector<16xf32>
    %176 = vector.multi_reduction <add>, %173, %cst_121 [0] : vector<64x16xf32> to vector<16xf32>
    %177 = vector.shape_cast %176 : vector<16xf32> to vector<1x16xf32>
    %178 = arith.mulf %173, %173 : vector<64x16xf32>
    %cst_122 = arith.constant dense<0.000000e+00> : vector<16xf32>
    %179 = vector.multi_reduction <add>, %178, %cst_122 [0] : vector<64x16xf32> to vector<16xf32>
    %180 = vector.shape_cast %179 : vector<16xf32> to vector<1x16xf32>
    %cst_123 = arith.constant 6.400000e+01 : f32
    %181 = vector.broadcast %cst_123 : f32 to vector<1x16xf32>
    %182 = arith.divf %177, %181 : vector<1x16xf32>
    %cst_124 = arith.constant 6.400000e+01 : f32
    %183 = vector.broadcast %cst_124 : f32 to vector<1x16xf32>
    %184 = arith.divf %180, %183 : vector<1x16xf32>
    %185 = arith.mulf %182, %182 : vector<1x16xf32>
    %186 = arith.subf %184, %185 : vector<1x16xf32>
    %cst_125 = arith.constant 9.99999974E-6 : f32
    %187 = vector.broadcast %cst_125 : f32 to vector<1x16xf32>
    %188 = arith.addf %186, %187 : vector<1x16xf32>
    %189 = math.rsqrt %188 : vector<1x16xf32>
    %190 = arith.mulf %174, %189 : vector<1x16xf32>
    %191 = arith.mulf %182, %190 : vector<1x16xf32>
    %192 = arith.subf %175, %191 : vector<1x16xf32>
    %193 = vector.broadcast %190 : vector<1x16xf32> to vector<64x16xf32>
    %194 = arith.mulf %173, %193 : vector<64x16xf32>
    %195 = vector.broadcast %192 : vector<1x16xf32> to vector<64x16xf32>
    %196 = arith.addf %194, %195 : vector<64x16xf32>
    %197 = arith.addf %196, %171 : vector<64x16xf32>
    %cst_126 = arith.constant 0.000000e+00 : f32
    %198 = vector.broadcast %cst_126 : f32 to vector<64x16xf32>
    %199 = arith.cmpf oge, %197, %198 : vector<64x16xf32>
    %cst_127 = arith.constant 0.00999999977 : f32
    %200 = vector.broadcast %cst_127 : f32 to vector<64x16xf32>
    %201 = arith.mulf %200, %197 : vector<64x16xf32>
    %202 = arith.select %199, %197, %201 : vector<64x16xi1>, vector<64x16xf32>
    %c0_128 = arith.constant 0 : index
    %c0_129 = arith.constant 0 : index
    %c0_130 = arith.constant 0 : index
    %203 = vector.load %arg14[%c0_128, %c0_129, %c0_130] : memref<1x64x16xf32, #tpu.memory_space<vmem>>, vector<1x64x16xf32>
    %204 = vector.shape_cast %203 : vector<1x64x16xf32> to vector<64x16xf32>
    %205 = vector.shape_cast %202 : vector<64x16xf32> to vector<1x64x16xf32>
    tpu.vector_store %arg14[%c0_128, %c0_129, %c0_130], %205 {strides = array<i32>} : memref<1x64x16xf32, #tpu.memory_space<vmem>>, vector<1x64x16xf32>,
    return
  }
  func.func @transform_0(%arg0: i32) -> (i32, i32, i32, i32) {
    %c0_i32 = arith.constant 0 : i32
    %c0_i32_0 = arith.constant 0 : i32
    %c0_i32_1 = arith.constant 0 : i32
    %c0_i32_2 = arith.constant 0 : i32
    return %arg0, %c0_i32, %c0_i32_0, %c0_i32_1 : i32, i32, i32, i32
  }
  func.func @transform_1(%arg0: i32) -> (i32, i32) {
    %c0_i32 = arith.constant 0 : i32
    %c0_i32_0 = arith.constant 0 : i32
    %c0_i32_1 = arith.constant 0 : i32
    return %c0_i32, %c0_i32_0 : i32, i32
  }
  func.func @transform_2(%arg0: i32) -> (i32, i32) {
    %c0_i32 = arith.constant 0 : i32
    %c0_i32_0 = arith.constant 0 : i32
    %c0_i32_1 = arith.constant 0 : i32
    return %c0_i32, %c0_i32_0 : i32, i32
  }
  func.func @transform_3(%arg0: i32) -> (i32, i32) {
    %c0_i32 = arith.constant 0 : i32
    %c0_i32_0 = arith.constant 0 : i32
    %c0_i32_1 = arith.constant 0 : i32
    return %c0_i32, %c0_i32_0 : i32, i32
  }
  func.func @transform_4(%arg0: i32) -> (i32, i32) {
    %c0_i32 = arith.constant 0 : i32
    %c0_i32_0 = arith.constant 0 : i32
    %c0_i32_1 = arith.constant 0 : i32
    return %c0_i32, %c0_i32_0 : i32, i32
  }
  func.func @transform_5(%arg0: i32) -> (i32, i32) {
    %c0_i32 = arith.constant 0 : i32
    %c0_i32_0 = arith.constant 0 : i32
    %c0_i32_1 = arith.constant 0 : i32
    return %c0_i32, %c0_i32_0 : i32, i32
  }
  func.func @transform_6(%arg0: i32) -> (i32, i32) {
    %c0_i32 = arith.constant 0 : i32
    %c0_i32_0 = arith.constant 0 : i32
    %c0_i32_1 = arith.constant 0 : i32
    return %c0_i32, %c0_i32_0 : i32, i32
  }
  func.func @transform_7(%arg0: i32) -> (i32, i32) {
    %c0_i32 = arith.constant 0 : i32
    %c0_i32_0 = arith.constant 0 : i32
    %c0_i32_1 = arith.constant 0 : i32
    return %c0_i32, %c0_i32_0 : i32, i32
  }
  func.func @transform_8(%arg0: i32) -> (i32, i32) {
    %c0_i32 = arith.constant 0 : i32
    %c0_i32_0 = arith.constant 0 : i32
    %c0_i32_1 = arith.constant 0 : i32
    return %c0_i32, %c0_i32_0 : i32, i32
  }
  func.func @transform_9(%arg0: i32) -> (i32, i32) {
    %c0_i32 = arith.constant 0 : i32
    %c0_i32_0 = arith.constant 0 : i32
    %c0_i32_1 = arith.constant 0 : i32
    return %c0_i32, %c0_i32_0 : i32, i32
  }
  func.func @transform_10(%arg0: i32) -> (i32, i32) {
    %c0_i32 = arith.constant 0 : i32
    %c0_i32_0 = arith.constant 0 : i32
    %c0_i32_1 = arith.constant 0 : i32
    return %c0_i32, %c0_i32_0 : i32, i32
  }
  func.func @transform_11(%arg0: i32) -> (i32, i32) {
    %c0_i32 = arith.constant 0 : i32
    %c0_i32_0 = arith.constant 0 : i32
    %c0_i32_1 = arith.constant 0 : i32
    return %c0_i32, %c0_i32_0 : i32, i32
  }
  func.func @transform_12(%arg0: i32) -> (i32, i32) {
    %c0_i32 = arith.constant 0 : i32
    %c0_i32_0 = arith.constant 0 : i32
    %c0_i32_1 = arith.constant 0 : i32
    return %c0_i32, %c0_i32_0 : i32, i32
  }
  func.func @transform_13(%arg0: i32) -> (i32, i32, i32) {
    %c0_i32 = arith.constant 0 : i32
    %c0_i32_0 = arith.constant 0 : i32
    %c0_i32_1 = arith.constant 0 : i32
    return %arg0, %c0_i32, %c0_i32_0 : i32, i32, i32
  }
}

</mosaic_0001>

<bundles_post_ra>
// kernel: bottleneck_d_forward.1
= control target key start
LH: loop header
LB: loop body
LE: loop exit
PB: predicated region body
PF: predicated region fallthrough
CT: control target
= control target key end

     0   :  { %s4012_s0 = inlined_call_operand.vmem [shape: f32[2,4,64,4], index: 0, kind: input, shape index: {}]   ;;  %s4013_s1 = inlined_call_operand.vmem [shape: f32[4,8], index: 1, kind: input, shape index: {}]   ;;  %s4014_s2 = inlined_call_operand.vmem [shape: f32[1,8], index: 2, kind: input, shape index: {}]   ;;  %s4015_s3 = inlined_call_operand.vmem [shape: f32[1,8], index: 3, kind: input, shape index: {}]   ;;  %s4016_s4 = inlined_call_operand.vmem [shape: f32[72,8], index: 4, kind: input, shape index: {}]   ;;  %s4017_s5 = inlined_call_operand.vmem [shape: f32[1,8], index: 5, kind: input, shape index: {}]   ;;  %s4018_s6 = inlined_call_operand.vmem [shape: f32[1,8], index: 6, kind: input, shape index: {}]   ;;  %s4019_s7 = inlined_call_operand.vmem [shape: f32[8,16], index: 7, kind: input, shape index: {}]   ;;  %s4020_s8 = inlined_call_operand.vmem [shape: f32[1,16], index: 8, kind: input, shape index: {}]   ;;  %s4021_s9 = inlined_call_operand.vmem [shape: f32[1,16], index: 9, kind: input, shape index: {}]   ;;  %s4022_s10 = inlined_call_operand.vmem [shape: f32[4,16], index: 10, kind: input, shape index: {}]   ;;  %s4023_s11 = inlined_call_operand.vmem [shape: f32[1,16], index: 11, kind: input, shape index: {}]   ;;  %s4024_s12 = inlined_call_operand.vmem [shape: f32[1,16], index: 12, kind: input, shape index: {}]   ;;  %s4025_s13 = inlined_call_operand.hbm [shape: f32[2,64,16], index: 13, kind: output, shape index: {}]  }
   0x1   :  { %4026 = sst [smem:[#allocation8_spill]] %s4012_s0 }
   0x2   :  { %4027 = sst [smem:[#allocation9_spill]] %s4013_s1 }
   0x3   :  { %4028 = sst [smem:[#allocation10_spill]] %s4014_s2 }
   0x4   :  { %18 = vsyncpa [#allocation4], 0 }
   0x5   :  { %20 = vsyncpa [#allocation4 + $0x1], 0  ;;  %s2811_s25 = smov 0   ;;  %s2813_s26 = smov 0  }
   0x6   :  { %s2815_s27 = smov 0   ;;  %s2817_s28 = smov 0  }
   0x7 LB: > { %s2832_s29 = sadd.s32 4294967295, %s2734_s28   ;;  %s2476_s30 = sadd.s32 4294967294, %s2734_s28   ;;  %s2734_s28 = sphi %s2817_s28, %s4041_s28   ;;  %s2730_s27 = sphi %s2815_s27, %s4040_s27   ;;  %s2726_s26 = sphi %s2813_s26, %s4039_s26   ;;  %s2722_s25 = sphi %s2811_s25, %s4038_s25  }
   0x8   : > { %s2836_s14 = sadd.s32 1, %s2734_s28   ;;  %s311_s15 = sadd.s32 1, %s2730_s27 }
   0x9   : > { %s308_s16 = ssub.s32 %s2734_s28, %s2836_s14  ;;  %p321_p0 = scmp.ne.s32.totalorder %s2730_s27, %s2726_s26 }
   0xa   : > { %p309_p1 = scmp.eq.s32.totalorder %s308_s16, 0  ;;  %p322_p2 = scmp.eq.s32.totalorder %s2832_s29, 1 }
   0xb   : > { %p327_p3 = scmp.ne.s32.totalorder %s2726_s26, %s2722_s25  ;;  %p328_p4 = scmp.eq.s32.totalorder %s2476_s30, 1 }
   0xc   : > { %s2847_s17 = scalar_select %p309_p1, %s2730_s27, %s311_s15  }
   0xd   : > { %p2849_p5 = por %p322_p2, %p321_p0  ;;  %p2853_p6 = por %p328_p4, %p327_p3 }
   0xe   : > { %p2479_p7 = scmp.ge.s32.totalorder %s2734_s28, 1  ;;  %p390_p8 = scmp.lt.s32.totalorder %s2734_s28, 3 }
  0x10   : > { %p391_p9 = pnand %p2479_p7, %p390_p8 }
  0x12   : > { %394 = sbr.rel (%p391_p9) target bundleno = 1143 (0x477), region = 72 }
  0x17   : > { %s4031_s1 = sld [smem:[#allocation9_spill]]  ;;  %vm569_vm0 = vcmask 1043456   ;;  %p434_p10 = scmp.lt.s32.totalorder %s2832_s29, 1  ;;  %vm472_vm1 = vcmask 31744   ;;  %vm688_vm2 = vcmask 64512   ;;  %vm1051_vm3 = vcmask 57344  }
  0x18   : > { %s4032_s0 = sld [smem:[#allocation8_spill]]  ;;  %v2736_v25 = vmov 0.0   ;;  %s431_s20 = sand.u32 1, %s2726_s26  }
  0x19   : > { %s435_s22 = scalar_select %p434_p10, %s2832_s29, 1  ;;  %1053 = vst.msk [vmem:[#allocation2 + $0x10] sm:$0xff] %vm688_vm2, %v2736_v25 }
  0x1a   : > { %1054 = vst.msk [vmem:[#allocation2 + $0x18] sm:$0x1] %vm1051_vm3, %v2736_v25  ;;  %s4035_s2 = sld [smem:[#allocation10_spill]]  ;;  %s2480_s21 = sshll.u32 %s431_s20, 6 }
  0x1b   : > { %s2610_s23 = sshll.u32 %s435_s22, 8  ;;  %1055 = vst.msk [vmem:[#allocation2 + $0x20] sm:$0xff] %vm688_vm2, %v2736_v25 }
  0x1c   : > { %1056 = vst.msk [vmem:[#allocation2 + $0x28] sm:$0x1] %vm1051_vm3, %v2736_v25 }
  0x1d   : > { %v471_v0 = vld [vmem:[%s4031_s1] sm:$0xf]  ;;  %1057 = vst.msk [vmem:[#allocation2 + $0x30] sm:$0xff] %vm688_vm2, %v2736_v25 }
  0x1e   : > { %2483 = vmatpush.msk.msra.mxu0 %vm569_vm0, %v471_v0  ;;  %2612 = vmatpush.msk.msra.mxu3 %vm569_vm0, %v471_v0  ;;  %s2869_s15 = scalar_lea.vmem %s4032_s0, %s2610_s23  ;;  %1058 = vst.msk [vmem:[#allocation2 + $0x38] sm:$0x1] %vm1051_vm3, %v2736_v25  ;;  %s2692_s0 = scalar_lea.hbm %s4025_s13, 128 }
  0x1f   : > { %v439_v1 = vld [vmem:[%s2869_s15] sm:$0xff]  ;;  %v440_v2 = vld [vmem:[%s2869_s15 + $0x8] sm:$0xff]  ;;  %v441_v3 = vld [vmem:[%s2869_s15 + $0x10] sm:$0xff]  ;;  %1059 = vst.msk [vmem:[#allocation2 + $0x40] sm:$0xff] %vm688_vm2, %v2736_v25 }
  0x20   : > { %2484 = vmatmul.msk.f32.vlgmr.msra.gmra.mxu0 %vm472_vm1, %v439_v1  ;;  %v442_v4 = vld [vmem:[%s2869_s15 + $0x18] sm:$0xff]  ;;  %v443_v5 = vld [vmem:[%s2869_s15 + $0x20] sm:$0xff]  ;;  %v444_v8 = vld [vmem:[%s2869_s15 + $0x28] sm:$0xff]  ;;  %1060 = vst.msk [vmem:[#allocation2 + $0x48] sm:$0x1] %vm1051_vm3, %v2736_v25 }
  0x21   : > { %v447_v6 = vld [vmem:[%s2869_s15 + $0x40] sm:$0xff]  ;;  %v448_v9 = vld [vmem:[%s2869_s15 + $0x48] sm:$0xff]  ;;  %v445_v11 = vld [vmem:[%s2869_s15 + $0x30] sm:$0xff]  ;;  %1061 = vst.msk [vmem:[#allocation2 + $0x50] sm:$0xff] %vm688_vm2, %v2736_v25 }
  0x22   : > { %v2882_v7 = vadd.f32 %v447_v6, %v439_v1  ;;  %v2887_v10 = vadd.f32 %v448_v9, %v440_v2  ;;  %v449_v12 = vld [vmem:[%s2869_s15 + $0x50] sm:$0xff]  ;;  %v446_v14 = vld [vmem:[%s2869_s15 + $0x38] sm:$0xff]  ;;  %v451_v17 = vld [vmem:[%s2869_s15 + $0x60] sm:$0xff]  ;;  %1062 = vst.msk [vmem:[#allocation2 + $0x58] sm:$0x1] %vm1051_vm3, %v2736_v25 }
  0x23   : > { %v2892_v13 = vadd.f32 %v449_v12, %v441_v3  ;;  %v450_v15 = vld [vmem:[%s2869_s15 + $0x58] sm:$0xff]  ;;  %v2901_v18 = vadd.f32 %v451_v17, %v443_v5  ;;  %v452_v19 = vld [vmem:[%s2869_s15 + $0x68] sm:$0xff]  ;;  %v453_v21 = vld [vmem:[%s2869_s15 + $0x70] sm:$0xff]  ;;  %1063 = vst.msk [vmem:[#allocation2 + $0x60] sm:$0xff] %vm688_vm2, %v2736_v25 }
  0x24   : > { %v2897_v16 = vadd.f32 %v450_v15, %v442_v4  ;;  %v2905_v20 = vadd.f32 %v452_v19, %v444_v8  ;;  %v2909_v22 = vadd.f32 %v453_v21, %v445_v11  ;;  %v454_v23 = vld [vmem:[%s2869_s15 + $0x78] sm:$0xff]  ;;  %1064 = vst.msk [vmem:[#allocation2 + $0x68] sm:$0x1] %vm1051_vm3, %v2736_v25  ;;  %v455_v27 = vld [vmem:[%s2869_s15 + $0x80] sm:$0xff]  ;;  %v456_v29 = vld [vmem:[%s2869_s15 + $0x88] sm:$0xff] }
  0x25   : > { %v2913_v24 = vadd.f32 %v454_v23, %v446_v14  ;;  %1065 = vst.msk [vmem:[#allocation2 + $0x70] sm:$0xff] %vm688_vm2, %v2736_v25  ;;  %v457_v30 = vld [vmem:[%s2869_s15 + $0x90] sm:$0xff]  ;;  %v2014_v31 = vadd.f32 %v2882_v7, %v455_v27  ;;  %v3002_v32 = vadd.f32 %v2887_v10, %v456_v29  ;;  %v458_v34 = vld [vmem:[%s2869_s15 + $0x98] sm:$0xff]  ;;  %v459_v35 = vld [vmem:[%s2869_s15 + $0xa0] sm:$0xff] }
  0x26   : > { %1066 = vst.msk [vmem:[#allocation2 + $0x78] sm:$0x1] %vm1051_vm3, %v2736_v25  ;;  %v2016_v33 = vadd.f32 %v2892_v13, %v457_v30  ;;  %v460_v36 = vld [vmem:[%s2869_s15 + $0xa8] sm:$0xff]  ;;  %v2017_v37 = vadd.f32 %v2897_v16, %v458_v34  ;;  %v2018_v38 = vadd.f32 %v2901_v18, %v459_v35  ;;  %v461_v41 = vld [vmem:[%s2869_s15 + $0xb0] sm:$0xff]  ;;  %v462_v44 = vld [vmem:[%s2869_s15 + $0xb8] sm:$0xff] }
  0x27   : > { %1067 = vst.msk [vmem:[#allocation2 + $0x80] sm:$0xff] %vm688_vm2, %v2736_v25  ;;  %v3013_v39 = vadd.f32 %v2905_v20, %v460_v36  ;;  %v2020_v42 = vadd.f32 %v2909_v22, %v461_v41  ;;  %v2021_v45 = vadd.f32 %v2913_v24, %v462_v44  ;;  %v463_v47 = vld [vmem:[%s2869_s15 + $0xc0] sm:$0xff]  ;;  %v465_v51 = vld [vmem:[%s2869_s15 + $0xd0] sm:$0xff]  ;;  %v466_v54 = vld [vmem:[%s2869_s15 + $0xd8] sm:$0xff] }
  0x28   : > { %2485 = vmatmul.msk.f32.gmra.mxu0 %vm472_vm1, %v440_v2  ;;  %1068 = vst.msk [vmem:[#allocation2 + $0x88] sm:$0x1] %vm1051_vm3, %v2736_v25  ;;  %v3077_v48 = vadd.f32 %v2014_v31, %v463_v47  ;;  %v3100_v52 = vadd.f32 %v2016_v33, %v465_v51  ;;  %v3106_v55 = vadd.f32 %v2017_v37, %v466_v54  ;;  %v469_v57 = vld [vmem:[%s2869_s15 + $0xf0] sm:$0xff]  ;;  %v467_v58 = vld [vmem:[%s2869_s15 + $0xe0] sm:$0xff]  ;;  %v464_v62 = vld [vmem:[%s2869_s15 + $0xc8] sm:$0xff] }
  0x29   : > { %1071 = vst.msk [vmem:[#allocation2 + $0xa0] sm:$0xff] %vm688_vm2, %v2736_v25  ;;  %2514 = vmatmul.msk.f32.vlgmr.msra.gmra.mxu3 %vm472_vm1, %v469_v57  ;;  %v3114_v59 = vadd.f32 %v2020_v42, %v469_v57  ;;  %v3116_v60 = vadd.f32 %v2018_v38, %v467_v58  ;;  %v470_v63 = vld [vmem:[%s2869_s15 + $0xf8] sm:$0xff]  ;;  %v468_v0 = vld [vmem:[%s2869_s15 + $0xe8] sm:$0xff] }
  0x2a   : > { %1072 = vst.msk [vmem:[#allocation2 + $0xa8] sm:$0x1] %vm1051_vm3, %v2736_v25  ;;  %v3125_v1 = vadd.f32 %v2021_v45, %v470_v63  ;;  %v3128_v2 = vadd.f32 %v3013_v39, %v468_v0 }
  0x2b   : > { %1073 = vst.msk [vmem:[#allocation2 + $0xb0] sm:$0xff] %vm688_vm2, %v2736_v25 }
  0x2c   : > { %1074 = vst.msk [vmem:[#allocation2 + $0xb8] sm:$0x1] %vm1051_vm3, %v2736_v25 }
  0x2d   : > { %1075 = vst.msk [vmem:[#allocation2 + $0xc0] sm:$0xff] %vm688_vm2, %v2736_v25 }
  0x2e   : > { %1076 = vst.msk [vmem:[#allocation2 + $0xc8] sm:$0x1] %vm1051_vm3, %v2736_v25 }
  0x2f   : > { %1077 = vst.msk [vmem:[#allocation2 + $0xd0] sm:$0xff] %vm688_vm2, %v2736_v25 }
  0x30   : > { %2486 = vmatmul.msk.f32.gmra.mxu0 %vm472_vm1, %v441_v3  ;;  %1078 = vst.msk [vmem:[#allocation2 + $0xd8] sm:$0x1] %vm1051_vm3, %v2736_v25 }
  0x31   : > { %1079 = vst.msk [vmem:[#allocation2 + $0xe0] sm:$0xff] %vm688_vm2, %v2736_v25  ;;  %2515 = vmatmul.msk.f32.gmra.mxu3 %vm472_vm1, %v470_v63 }
  0x32   : > { %1080 = vst.msk [vmem:[#allocation2 + $0xe8] sm:$0x1] %vm1051_vm3, %v2736_v25 }
  0x33   : > { %1081 = vst.msk [vmem:[#allocation2 + $0xf0] sm:$0xff] %vm688_vm2, %v2736_v25 }
  0x34   : > { %1082 = vst.msk [vmem:[#allocation2 + $0xf8] sm:$0x1] %vm1051_vm3, %v2736_v25 }
  0x35   : > { %1083 = vst.msk [vmem:[#allocation2 + $0x100] sm:$0xff] %vm688_vm2, %v2736_v25 }
  0x36   : > { %1084 = vst.msk [vmem:[#allocation2 + $0x108] sm:$0x1] %vm1051_vm3, %v2736_v25 }
  0x37   : > { %1085 = vst.msk [vmem:[#allocation2 + $0x110] sm:$0xff] %vm688_vm2, %v2736_v25 }
  0x38   : > { %2487 = vmatmul.msk.f32.gmra.mxu0 %vm472_vm1, %v442_v4  ;;  %1086 = vst.msk [vmem:[#allocation2 + $0x118] sm:$0x1] %vm1051_vm3, %v2736_v25 }
  0x39   : > { %1087 = vst.msk [vmem:[#allocation2 + $0x120] sm:$0xff] %vm688_vm2, %v2736_v25 }
  0x3a   : > { %1088 = vst.msk [vmem:[#allocation2 + $0x128] sm:$0x1] %vm1051_vm3, %v2736_v25 }
  0x3b   : > { %1089 = vst.msk [vmem:[#allocation2 + $0x130] sm:$0xff] %vm688_vm2, %v2736_v25 }
  0x3c   : > { %1090 = vst.msk [vmem:[#allocation2 + $0x138] sm:$0x1] %vm1051_vm3, %v2736_v25 }
  0x3d   : > { %1091 = vst.msk [vmem:[#allocation2 + $0x140] sm:$0xff] %vm688_vm2, %v2736_v25 }
  0x3e   : > { %1092 = vst.msk [vmem:[#allocation2 + $0x148] sm:$0x1] %vm1051_vm3, %v2736_v25 }
  0x3f   : > { %1093 = vst.msk [vmem:[#allocation2 + $0x150] sm:$0xff] %vm688_vm2, %v2736_v25 }
  0x40   : > { %2488 = vmatmul.msk.f32.gmra.mxu0 %vm472_vm1, %v443_v5  ;;  %1094 = vst.msk [vmem:[#allocation2 + $0x158] sm:$0x1] %vm1051_vm3, %v2736_v25 }
  0x41   : > { %1095 = vst.msk [vmem:[#allocation2 + $0x160] sm:$0xff] %vm688_vm2, %v2736_v25 }
  0x42   : > { %1096 = vst.msk [vmem:[#allocation2 + $0x168] sm:$0x1] %vm1051_vm3, %v2736_v25 }
  0x43   : > { %1097 = vst.msk [vmem:[#allocation2 + $0x170] sm:$0xff] %vm688_vm2, %v2736_v25 }
  0x44   : > { %1098 = vst.msk [vmem:[#allocation2 + $0x178] sm:$0x1] %vm1051_vm3, %v2736_v25 }
  0x45   : > { %1099 = vst.msk [vmem:[#allocation2 + $0x180] sm:$0xff] %vm688_vm2, %v2736_v25 }
  0x46   : > { %1100 = vst.msk [vmem:[#allocation2 + $0x188] sm:$0x1] %vm1051_vm3, %v2736_v25 }
  0x47   : > { %1101 = vst.msk [vmem:[#allocation2 + $0x190] sm:$0xff] %vm688_vm2, %v2736_v25 }
  0x48   : > { %2489 = vmatmul.msk.f32.gmra.mxu0 %vm472_vm1, %v444_v8  ;;  %1102 = vst.msk [vmem:[#allocation2 + $0x198] sm:$0x1] %vm1051_vm3, %v2736_v25 }
  0x49   : > { %1103 = vst.msk [vmem:[#allocation2 + $0x1a0] sm:$0xff] %vm688_vm2, %v2736_v25 }
  0x4a   : > { %1104 = vst.msk [vmem:[#allocation2 + $0x1a8] sm:$0x1] %vm1051_vm3, %v2736_v25 }
  0x4b   : > { %1105 = vst.msk [vmem:[#allocation2 + $0x1b0] sm:$0xff] %vm688_vm2, %v2736_v25 }
  0x4c   : > { %1106 = vst.msk [vmem:[#allocation2 + $0x1b8] sm:$0x1] %vm1051_vm3, %v2736_v25 }
  0x4d   : > { %1107 = vst.msk [vmem:[#allocation2 + $0x1c0] sm:$0xff] %vm688_vm2, %v2736_v25 }
  0x4e   : > { %1108 = vst.msk [vmem:[#allocation2 + $0x1c8] sm:$0x1] %vm1051_vm3, %v2736_v25 }
  0x4f   : > { %1109 = vst.msk [vmem:[#allocation2 + $0x1d0] sm:$0xff] %vm688_vm2, %v2736_v25 }
  0x50   : > { %2490 = vmatmul.msk.f32.gmra.mxu0 %vm472_vm1, %v445_v11  ;;  %1110 = vst.msk [vmem:[#allocation2 + $0x1d8] sm:$0x1] %vm1051_vm3, %v2736_v25 }
  0x51   : > { %1111 = vst.msk [vmem:[#allocation2 + $0x1e0] sm:$0xff] %vm688_vm2, %v2736_v25 }
  0x52   : > { %1112 = vst.msk [vmem:[#allocation2 + $0x1e8] sm:$0x1] %vm1051_vm3, %v2736_v25 }
  0x53   : > { %1113 = vst.msk [vmem:[#allocation2 + $0x1f0] sm:$0xff] %vm688_vm2, %v2736_v25 }
  0x54   : > { %1114 = vst.msk [vmem:[#allocation2 + $0x1f8] sm:$0x1] %vm1051_vm3, %v2736_v25 }
  0x55   : > { %1115 = vst.msk [vmem:[#allocation2 + $0x200] sm:$0xff] %vm688_vm2, %v2736_v25 }
  0x56   : > { %1116 = vst.msk [vmem:[#allocation2 + $0x208] sm:$0x1] %vm1051_vm3, %v2736_v25 }
  0x57   : > { %1117 = vst.msk [vmem:[#allocation2 + $0x210] sm:$0xff] %vm688_vm2, %v2736_v25 }
  0x58   : > { %2491 = vmatmul.msk.f32.gmra.mxu0 %vm472_vm1, %v446_v14  ;;  %1118 = vst.msk [vmem:[#allocation2 + $0x218] sm:$0x1] %vm1051_vm3, %v2736_v25 }
  0x59   : > { %1119 = vst.msk [vmem:[#allocation2 + $0x220] sm:$0xff] %vm688_vm2, %v2736_v25 }
  0x5a   : > { %1120 = vst.msk [vmem:[#allocation2 + $0x228] sm:$0x1] %vm1051_vm3, %v2736_v25 }
  0x5b   : > { %1121 = vst.msk [vmem:[#allocation2 + $0x230] sm:$0xff] %vm688_vm2, %v2736_v25 }
  0x5c   : > { %1122 = vst.msk [vmem:[#allocation2 + $0x238] sm:$0x1] %vm1051_vm3, %v2736_v25 }
  0x5d   : > { %4033 = vst [vmem:[#allocation6_spill] sm:$0xff] %v3114_v59 }
  0x5e   : > { %4034 = vst [vmem:[#allocation7_spill] sm:$0xff] %v3125_v1 }
  0x60   : > { %2492 = vmatmul.msk.f32.gmra.mxu0 %vm472_vm1, %v447_v6 }
  0x68   : > { %2493 = vmatmul.msk.f32.gmra.mxu0 %vm472_vm1, %v448_v9 }
  0x70   : > { %2494 = vmatmul.msk.f32.gmra.mxu0 %vm472_vm1, %v449_v12 }
  0x78   : > { %2495 = vmatmul.msk.f32.gmra.mxu0 %vm472_vm1, %v450_v15 }
  0x80   : > { %2496 = vmatmul.msk.f32.gmra.mxu0 %vm472_vm1, %v451_v17 }
  0x88   : > { %2497 = vmatmul.msk.f32.gmra.mxu0 %vm472_vm1, %v452_v19 }
  0x90   : > { %2498 = vmatmul.msk.f32.gmra.mxu0 %vm472_vm1, %v453_v21 }
  0x98   : > { %2499 = vmatmul.msk.f32.gmra.mxu0 %vm472_vm1, %v454_v23 }
  0x9d   : > { %v2967_v26 = vpop.f32.mrf.mxu0 }
  0x9e   : > { %v758_v16 = vmul.f32 %v2967_v26, %v2967_v26  ;;  %v689_v20 = vsel %vm688_vm2, %v2967_v26, 0.0 }
  0xa0   : > { %2500 = vmatmul.msk.f32.gmra.mxu0 %vm472_vm1, %v455_v27  ;;  %v790_v25 = vsel %vm688_vm2, %v758_v16, 0.0 }
  0xa5   : > { %v2989_v28 = vpop.f32.mrf.mxu0 }
  0xa6   : > { %v759_v15 = vmul.f32 %v2989_v28, %v2989_v28  ;;  %v690_v17 = vsel %vm688_vm2, %v2989_v28, 0.0 }
  0xa7   : > { %v691_v24 = vadd.f32 %v690_v17, %v689_v20 }
  0xa8   : > { %2501 = vmatmul.msk.f32.gmra.mxu0 %vm472_vm1, %v456_v29  ;;  %v791_v21 = vsel %vm688_vm2, %v759_v15, 0.0 }
  0xa9   : > { %v792_v31 = vadd.f32 %v791_v21, %v790_v25 }
  0xad   : > { %v3023_v40 = vpop.f32.mrf.mxu0 }
  0xae   : > { %v760_v18 = vmul.f32 %v3023_v40, %v3023_v40  ;;  %v692_v22 = vsel %vm688_vm2, %v3023_v40, 0.0 }
  0xaf   : > { %v693_v33 = vadd.f32 %v692_v22, %v691_v24 }
  0xb0   : > { %2502 = vmatmul.msk.f32.gmra.mxu0 %vm472_vm1, %v457_v30  ;;  %v793_v27 = vsel %vm688_vm2, %v760_v18, 0.0 }
  0xb1   : > { %v794_v37 = vadd.f32 %v793_v27, %v792_v31 }
  0xb5   : > { %v3044_v43 = vpop.f32.mrf.mxu0 }
  0xb6   : > { %v761_v23 = vmul.f32 %v3044_v43, %v3044_v43  ;;  %v694_v29 = vsel %vm688_vm2, %v3044_v43, 0.0 }
  0xb7   : > { %v695_v38 = vadd.f32 %v694_v29, %v693_v33 }
  0xb8   : > { %2503 = vmatmul.msk.f32.gmra.mxu0 %vm472_vm1, %v458_v34  ;;  %v795_v34 = vsel %vm688_vm2, %v761_v23, 0.0 }
  0xbd   : > { %v3065_v46 = vpop.f32.mrf.mxu0 }
  0xbe   : > { %v762_v30 = vmul.f32 %v3065_v46, %v3065_v46 }
  0xc0   : > { %2504 = vmatmul.msk.f32.gmra.mxu0 %vm472_vm1, %v459_v35  ;;  %v696_v35 = vsel %vm688_vm2, %v3065_v46, 0.0  ;;  %v797_v39 = vsel %vm688_vm2, %v762_v30, 0.0 }
  0xc1   : > { %v697_v45 = vadd.f32 %v696_v35, %v695_v38 }
  0xc5   : > { %v3087_v49 = vpop.f32.mrf.mxu0 }
  0xc8   : > { %2505 = vmatmul.msk.f32.gmra.mxu0 %vm472_vm1, %v460_v36  ;;  %v763_v36 = vmul.f32 %v3087_v49, %v3087_v49 }
  0xcd   : > { %v3096_v50 = vpop.f32.mrf.mxu0 }
  0xce   : > { %v764_v42 = vmul.f32 %v3096_v50, %v3096_v50 }
  0xd0   : > { %2506 = vmatmul.msk.f32.gmra.mxu0 %vm472_vm1, %v461_v41  ;;  %v698_v41 = vsel %vm688_vm2, %v3087_v49, 0.0  ;;  %v801_v63 = vsel %vm688_vm2, %v764_v42, 0.0 }
  0xd5   : > { %v3102_v53 = vpop.f32.mrf.mxu0 }
  0xd6   : > { %v765_v57 = vmul.f32 %v3102_v53, %v3102_v53 }
  0xd8   : > { %2507 = vmatmul.msk.f32.gmra.mxu0 %vm472_vm1, %v462_v44  ;;  %v796_v44 = vadd.f32 %v795_v34, %v794_v37  ;;  %v803_v18 = vsel %vm688_vm2, %v765_v57, 0.0 }
  0xdd   : > { %v3108_v56 = vpop.f32.mrf.mxu0 }
  0xde   : > { %v766_v15 = vmul.f32 %v3108_v56, %v3108_v56  ;;  %v704_v20 = vsel %vm688_vm2, %v3108_v56, 0.0 }
  0xe0   : > { %2508 = vmatmul.msk.f32.gmra.mxu0 %vm472_vm1, %v463_v47  ;;  %v805_v24 = vsel %vm688_vm2, %v766_v15, 0.0 }
  0xe5   : > { %v3118_v61 = vpop.f32.mrf.mxu0 }
  0xe6   : > { %v767_v21 = vmul.f32 %v3118_v61, %v3118_v61  ;;  %v706_v25 = vsel %vm688_vm2, %v3118_v61, 0.0 }
  0xe8   : > { %2509 = vmatmul.msk.f32.gmra.mxu0 %vm472_vm1, %v464_v62  ;;  %v699_v62 = vadd.f32 %v698_v41, %v697_v45  ;;  %v807_v33 = vsel %vm688_vm2, %v767_v21, 0.0 }
  0xed   : > { %v3130_v3 = vpop.f32.mrf.mxu0 }
  0xee   : > { %v768_v27 = vmul.f32 %v3130_v3, %v3130_v3  ;;  %v708_v34 = vsel %vm688_vm2, %v3130_v3, 0.0 }
  0xf0   : > { %2510 = vmatmul.msk.f32.gmra.mxu0 %vm472_vm1, %v465_v51  ;;  %v799_v51 = vsel %vm688_vm2, %v763_v36, 0.0  ;;  %v809_v38 = vsel %vm688_vm2, %v768_v27, 0.0 }
  0xf5   : > { %v3133_v4 = vpop.f32.mrf.mxu0 }
  0xf6   : > { %v769_v35 = vmul.f32 %v3133_v4, %v3133_v4 }
  0xf8   : > { %2511 = vmatmul.msk.f32.gmra.mxu0 %vm472_vm1, %v466_v54  ;;  %v700_v54 = vsel %vm688_vm2, %v3096_v50, 0.0  ;;  %v811_v45 = vsel %vm688_vm2, %v769_v35, 0.0 }
  0xf9   : > { %v701_v16 = vadd.f32 %v700_v54, %v699_v62 }
  0xfd   : > { %v3136_v5 = vpop.f32.mrf.mxu0 }
  0xfe   : > { %v770_v41 = vmul.f32 %v3136_v5, %v3136_v5 }
 0x100   : > { %2512 = vmatmul.msk.f32.gmra.mxu0 %vm472_vm1, %v467_v58  ;;  %v798_v58 = vadd.f32 %v797_v39, %v796_v44  ;;  %v710_v39 = vsel %vm688_vm2, %v3133_v4, 0.0  ;;  %v813_v62 = vsel %vm688_vm2, %v770_v41, 0.0 }
 0x102   : > { %v800_v17 = vadd.f32 %v799_v51, %v798_v58  ;;  %v712_v51 = vsel %vm688_vm2, %v3136_v5, 0.0 }
 0x104   : > { %v802_v22 = vadd.f32 %v801_v63, %v800_v17 }
 0x105   : > { %v3139_v6 = vpop.f32.mrf.mxu0 }
 0x106   : > { %v804_v29 = vadd.f32 %v803_v18, %v802_v22  ;;  %v771_v54 = vmul.f32 %v3139_v6, %v3139_v6  ;;  %v714_v63 = vsel %vm688_vm2, %v3139_v6, 0.0 }
 0x108   : > { %2513 = vmatmul.msk.f32.gmra.mxu0 %vm472_vm1, %v468_v0  ;;  %v702_v0 = vsel %vm688_vm2, %v3102_v53, 0.0  ;;  %v806_v36 = vadd.f32 %v805_v24, %v804_v29  ;;  %v815_v18 = vsel %vm688_vm2, %v771_v54, 0.0 }
 0x109   : > { %v703_v23 = vadd.f32 %v702_v0, %v701_v16 }
 0x10a   : > { %v808_v42 = vadd.f32 %v807_v33, %v806_v36 }
 0x10b   : > { %v705_v30 = vadd.f32 %v704_v20, %v703_v23 }
 0x10c   : > { %v810_v57 = vadd.f32 %v809_v38, %v808_v42 }
 0x10d   : > { %v3142_v7 = vpop.f32.mrf.mxu0  ;;  %v707_v37 = vadd.f32 %v706_v25, %v705_v30 }
 0x10e   : > { %v772_v0 = vmul.f32 %v3142_v7, %v3142_v7  ;;  %v812_v15 = vadd.f32 %v811_v45, %v810_v57  ;;  %v716_v20 = vsel %vm688_vm2, %v3142_v7, 0.0 }
 0x10f   : > { %v709_v44 = vadd.f32 %v708_v34, %v707_v37 }
 0x110   : > { %v814_v22 = vadd.f32 %v813_v62, %v812_v15  ;;  %v817_v24 = vsel %vm688_vm2, %v772_v0, 0.0 }
 0x111   : > { %v711_v58 = vadd.f32 %v710_v39, %v709_v44 }
 0x112   : > { %v816_v29 = vadd.f32 %v815_v18, %v814_v22 }
 0x113   : > { %v713_v16 = vadd.f32 %v712_v51, %v711_v58 }
 0x114   : > { %v818_v36 = vadd.f32 %v817_v24, %v816_v29 }
 0x115   : > { %v3144_v8 = vpop.f32.mrf.mxu0  ;;  %v715_v23 = vadd.f32 %v714_v63, %v713_v16 }
 0x116   : > { %v773_v21 = vmul.f32 %v3144_v8, %v3144_v8  ;;  %v718_v25 = vsel %vm688_vm2, %v3144_v8, 0.0 }
 0x117   : > { %v717_v30 = vadd.f32 %v716_v20, %v715_v23 }
 0x118   : > { %v819_v33 = vsel %vm688_vm2, %v773_v21, 0.0 }
 0x119   : > { %v719_v37 = vadd.f32 %v718_v25, %v717_v30  ;;  %v820_v42 = vadd.f32 %v819_v33, %v818_v36 }
 0x11d   : > { %v3146_v9 = vpop.f32.mrf.mxu0 }
 0x11e   : > { %v774_v27 = vmul.f32 %v3146_v9, %v3146_v9  ;;  %v720_v34 = vsel %vm688_vm2, %v3146_v9, 0.0 }
 0x11f   : > { %v721_v44 = vadd.f32 %v720_v34, %v719_v37 }
 0x120   : > { %v821_v38 = vsel %vm688_vm2, %v774_v27, 0.0 }
 0x121   : > { %v822_v58 = vadd.f32 %v821_v38, %v820_v42 }
 0x125   : > { %v3148_v10 = vpop.f32.mrf.mxu0 }
 0x126   : > { %v775_v35 = vmul.f32 %v3148_v10, %v3148_v10  ;;  %v722_v39 = vsel %vm688_vm2, %v3148_v10, 0.0 }
 0x127   : > { %v723_v62 = vadd.f32 %v722_v39, %v721_v44 }
 0x128   : > { %v823_v51 = vsel %vm688_vm2, %v775_v35, 0.0 }
 0x129   : > { %v824_v16 = vadd.f32 %v823_v51, %v822_v58 }
 0x12d   : > { %v3150_v11 = vpop.f32.mrf.mxu0 }
 0x12e   : > { %v776_v41 = vmul.f32 %v3150_v11, %v3150_v11  ;;  %v724_v54 = vsel %vm688_vm2, %v3150_v11, 0.0 }
 0x12f   : > { %v725_v18 = vadd.f32 %v724_v54, %v723_v62 }
 0x130   : > { %v825_v63 = vsel %vm688_vm2, %v776_v41, 0.0 }
 0x131   : > { %v826_v23 = vadd.f32 %v825_v63, %v824_v16 }
 0x135   : > { %v3152_v12 = vpop.f32.mrf.mxu0 }
 0x136   : > { %v777_v57 = vmul.f32 %v3152_v12, %v3152_v12  ;;  %v726_v0 = vsel %vm688_vm2, %v3152_v12, 0.0 }
 0x137   : > { %v727_v24 = vadd.f32 %v726_v0, %v725_v18 }
 0x138   : > { %v827_v20 = vsel %vm688_vm2, %v777_v57, 0.0  ;;  %v3291_v57 = vpop.f32.mrf.mxu3 }
 0x139   : > { %v828_v30 = vadd.f32 %v827_v20, %v826_v23 }
 0x13d   : > { %v3154_v13 = vpop.f32.mrf.mxu0 }
 0x13e   : > { %v778_v15 = vmul.f32 %v3154_v13, %v3154_v13  ;;  %v728_v21 = vsel %vm688_vm2, %v3154_v13, 0.0 }
 0x13f   : > { %v729_v33 = vadd.f32 %v728_v21, %v727_v24  ;;  %v2737_v24 = vmov 256.0  }
 0x140   : > { %v829_v25 = vsel %vm688_vm2, %v778_v15, 0.0  ;;  %2659 = vrcp.f32 %v2737_v24 }
 0x141   : > { %v830_v38 = vadd.f32 %v829_v25, %v828_v30 }
 0x145   : > { %v3156_v14 = vpop.f32.mrf.mxu0 }
 0x146   : > { %v779_v22 = vmul.f32 %v3156_v14, %v3156_v14  ;;  %v730_v27 = vsel %vm688_vm2, %v3156_v14, 0.0 }
 0x147   : > { %v731_v39 = vadd.f32 %v730_v27, %v729_v33 }
 0x148   : > { %v831_v35 = vsel %vm688_vm2, %v779_v22, 0.0 }
 0x149   : > { %v832_v51 = vadd.f32 %v831_v35, %v830_v38 }
 0x14d   : > { %v3166_v19 = vpop.f32.mrf.mxu0 }
 0x14e   : > { %v780_v29 = vmul.f32 %v3166_v19, %v3166_v19  ;;  %v732_v36 = vsel %vm688_vm2, %v3166_v19, 0.0 }
 0x14f   : > { %v733_v54 = vadd.f32 %v732_v36, %v731_v39 }
 0x150   : > { %v833_v41 = vsel %vm688_vm2, %v780_v29, 0.0 }
 0x151   : > { %v834_v0 = vadd.f32 %v833_v41, %v832_v51 }
 0x155   : > { %v3191_v47 = vpop.f32.mrf.mxu0 }
 0x156   : > { %v781_v37 = vmul.f32 %v3191_v47, %v3191_v47  ;;  %v734_v42 = vsel %vm688_vm2, %v3191_v47, 0.0 }
 0x157   : > { %v735_v15 = vadd.f32 %v734_v42, %v733_v54 }
 0x158   : > { %v835_v58 = vsel %vm688_vm2, %v781_v37, 0.0 }
 0x159   : > { %v836_v21 = vadd.f32 %v835_v58, %v834_v0  ;;  %v3318_v58 = vpop.f32.mrf.mxu3 }
 0x15d   : > { %v3213_v31 = vpop.f32.mrf.mxu0 }
 0x15e   : > { %v782_v44 = vmul.f32 %v3213_v31, %v3213_v31  ;;  %v736_v62 = vsel %vm688_vm2, %v3213_v31, 0.0 }
 0x15f   : > { %v737_v22 = vadd.f32 %v736_v62, %v735_v15  ;;  %v788_v15 = vmul.f32 %v3291_v57, %v3291_v57 }
 0x160   : > { %v837_v16 = vsel %vm688_vm2, %v782_v44, 0.0  ;;  %v2660_v44 = vpop.eup %2659 }
 0x161   : > { %v838_v30 = vadd.f32 %v837_v16, %v836_v21  ;;  %v789_v21 = vmul.f32 %v3318_v58, %v3318_v58  ;;  %vm864_vm4 = vweird.f32 %v2660_v44 }
 0x165   : > { %v3235_v17 = vpop.f32.mrf.mxu0 }
 0x166   : > { %v783_v63 = vmul.f32 %v3235_v17, %v3235_v17  ;;  %v738_v18 = vsel %vm688_vm2, %v3235_v17, 0.0 }
 0x167   : > { %v739_v33 = vadd.f32 %v738_v18, %v737_v22  ;;  %v860_v22 = vmul.f32 256.0, %v2660_v44 }
 0x168   : > { %v839_v25 = vsel %vm688_vm2, %v783_v63, 0.0 }
 0x169   : > { %v840_v38 = vadd.f32 %v839_v25, %v838_v30  ;;  %v750_v30 = vsel %vm688_vm2, %v3318_v58, 0.0 }
 0x16d   : > { %v3257_v45 = vpop.f32.mrf.mxu0 }
 0x16e   : > { %v784_v20 = vmul.f32 %v3257_v45, %v3257_v45  ;;  %v740_v27 = vsel %vm688_vm2, %v3257_v45, 0.0 }
 0x16f   : > { %v741_v39 = vadd.f32 %v740_v27, %v739_v33  ;;  %v748_v27 = vsel %vm688_vm2, %v3291_v57, 0.0 }
 0x170   : > { %v841_v35 = vsel %vm688_vm2, %v784_v20, 0.0 }
 0x171   : > { %v842_v51 = vadd.f32 %v841_v35, %v840_v38  ;;  %v861_v38 = vsub.f32 1.0, %v860_v22 }
 0x175   : > { %v3279_v34 = vpop.f32.mrf.mxu0 }
 0x176   : > { %v785_v29 = vmul.f32 %v3279_v34, %v3279_v34  ;;  %v742_v36 = vsel %vm688_vm2, %v3279_v34, 0.0 }
 0x177   : > { %v743_v54 = vadd.f32 %v742_v36, %v741_v39  ;;  %v849_v36 = vsel %vm688_vm2, %v788_v15, 0.0 }
 0x178   : > { %v843_v41 = vsel %vm688_vm2, %v785_v29, 0.0 }
 0x179   : > { %v844_v63 = vadd.f32 %v843_v41, %v842_v51 }
 0x17d   : > { %v3303_v23 = vpop.f32.mrf.mxu0 }
 0x17e   : > { %v786_v37 = vmul.f32 %v3303_v23, %v3303_v23  ;;  %v744_v42 = vsel %vm688_vm2, %v3303_v23, 0.0 }
 0x17f   : > { %v745_v0 = vadd.f32 %v744_v42, %v743_v54  ;;  %v862_v54 = vmul.f32 %v2660_v44, %v861_v38 }
 0x180   : > { %v845_v62 = vsel %vm688_vm2, %v786_v37, 0.0  ;;  %v851_v37 = vsel %vm688_vm2, %v789_v21, 0.0 }
 0x181   : > { %v846_v24 = vadd.f32 %v845_v62, %v844_v63 }
 0x185   : > { %v3323_v16 = vpop.f32.mrf.mxu0 }
 0x186   : > { %v746_v18 = vsel %vm688_vm2, %v3323_v16, 0.0  ;;  %v787_v20 = vmul.f32 %v3323_v16, %v3323_v16 }
 0x187   : > { %v747_v25 = vadd.f32 %v746_v18, %v745_v0 }
 0x188   : > { %v847_v29 = vsel %vm688_vm2, %v787_v20, 0.0  ;;  %v863_v20 = vadd.f32 %v2660_v44, %v862_v54 }
 0x189   : > { %v749_v33 = vadd.f32 %v748_v27, %v747_v25  ;;  %v848_v35 = vadd.f32 %v847_v29, %v846_v24 }
 0x18a   : > { %v865_v27 = vsel %vm864_vm4, %v2660_v44, %v863_v20 }
 0x18b   : > { %v850_v39 = vadd.f32 %v849_v36, %v848_v35  ;;  %v751_v41 = vadd.f32 %v750_v30, %v749_v33 }
 0x18d   : > { %v752_v42 = vrot.slane %v751_v41, 4  ;;  %v852_v51 = vadd.f32 %v851_v37, %v850_v39  ;;  %v1178_v37 = vld [vmem:[%s4016_s4 + $0x8] sm:$0xff] }
 0x18e   : > { %2613 = vmatpush.msrb.mxu3 %v1178_v37  ;;  %1218 = vmatpush.msra.mxu1 %v1178_v37 }
 0x18f   : > { %v753_v62 = vadd.f32 %v752_v42, %v751_v41  ;;  %v853_v63 = vrot.slane %v852_v51, 4 }
 0x191   : > { %v754_v0 = vrot.slane %v753_v62, 2  ;;  %v854_v18 = vadd.f32 %v853_v63, %v852_v51 }
 0x193   : > { %v755_v1 = vadd.f32 %v754_v0, %v753_v62  ;;  %v855_v59 = vrot.slane %v854_v18, 2  ;;  %v687_v62 = vld [vmem:[%s4015_s3] sm:$0x1] }
 0x195   : > { %v756_v25 = vrot.slane %v755_v1, 1  ;;  %v856_v24 = vadd.f32 %v855_v59, %v854_v18 }
 0x197   : > { %v757_v15 = vadd.f32 %v756_v25, %v755_v1  ;;  %v857_v29 = vrot.slane %v856_v24, 1  ;;  %v686_v1 = vld [vmem:[%s4035_s2] sm:$0x1] }
 0x199   : > { %v858_v21 = vadd.f32 %v857_v29, %v856_v24  ;;  %v866_v22 = vmul.f32 %v865_v27, %v757_v15 }
 0x19b   : > { %v867_v35 = vmul.f32 %v865_v27, %v858_v21  ;;  %v868_v30 = vmul.f32 %v866_v22, %v866_v22 }
 0x19d   : > { %v869_v33 = vsub.f32 %v867_v35, %v868_v30 }
 0x19f   : > { %v870_v36 = vadd.f32 1e-05, %v869_v33 }
 0x1a1   : > { %2661 = vrsqrt.f32 %v870_v36  ;;  %vm877_vm6 = vweird.f32 %v870_v36 }
 0x1a7   : > { %v2662_v38 = vpop.eup %2661 }
 0x1a8   : > { %v872_v39 = vmul.f32 %v2662_v38, %v870_v36  ;;  %vm878_vm5 = vweird.f32 %v2662_v38 }
 0x1a9   : > { %vm879_vm7 = vmor %vm877_vm6, %vm878_vm5 }
 0x1aa   : > { %v873_v41 = vmul.f32 %v2662_v38, %v872_v39 }
 0x1ac   : > { %v874_v59 = vmul.f32 0.5, %v873_v41 }
 0x1ae   : > { %v875_v44 = vsub.f32 1.5, %v874_v59 }
 0x1b0   : > { %v876_v42 = vmul.f32 %v2662_v38, %v875_v44 }
 0x1b2   : > { %v880_v51 = vsel %vm879_vm7, %v2662_v38, %v876_v42 }
 0x1b3   : > { %v881_v54 = vmul.f32 %v880_v51, %v686_v1 }
 0x1b5   : > { %v882_v63 = vmul.f32 %v881_v54, %v866_v22  ;;  %v885_v0 = vperm.slane %v881_v54, 0 }
 0x1b7   : > { %v883_v18 = vsub.f32 %v687_v62, %v882_v63  ;;  %v918_v20 = vmul.f32 %v885_v0, %v3318_v58  ;;  %v887_v29 = vmul.f32 %v885_v0, %v2967_v26  ;;  %v888_v21 = vmul.f32 %v885_v0, %v2989_v28 }
 0x1b8   : > { %v889_v35 = vmul.f32 %v885_v0, %v3023_v40  ;;  %v890_v22 = vmul.f32 %v885_v0, %v3044_v43  ;;  %v891_v30 = vmul.f32 %v885_v0, %v3065_v46  ;;  %v892_v58 = vmul.f32 %v885_v0, %v3087_v49 }
 0x1b9   : > { %v3348_v25 = vperm.slane %v883_v18, 0  ;;  %v893_v33 = vmul.f32 %v885_v0, %v3096_v50  ;;  %v894_v36 = vmul.f32 %v885_v0, %v3102_v53  ;;  %v895_v37 = vmul.f32 %v885_v0, %v3108_v56 }
 0x1ba   : > { %v896_v38 = vmul.f32 %v885_v0, %v3118_v61  ;;  %v897_v26 = vmul.f32 %v885_v0, %v3130_v3  ;;  %v898_v28 = vmul.f32 %v885_v0, %v3133_v4  ;;  %v899_v40 = vmul.f32 %v885_v0, %v3136_v5 }
 0x1bb   : > { %v953_v24 = vadd.f32 %v3348_v25, %v918_v20  ;;  %v900_v43 = vmul.f32 %v885_v0, %v3139_v6  ;;  %v901_v46 = vmul.f32 %v885_v0, %v3142_v7  ;;  %v3368_v49 = vmul.f32 %v885_v0, %v3144_v8 }
 0x1bc   : > { %v3371_v50 = vmul.f32 %v885_v0, %v3146_v9  ;;  %v922_v53 = vadd.f32 %v3348_v25, %v887_v29  ;;  %v3375_v56 = vmul.f32 %v885_v0, %v3148_v10  ;;  %v3378_v61 = vmul.f32 %v885_v0, %v3150_v11 }
 0x1bd   : > { %vm985_vm8 = vcmp.ge.f32.partialorder %v953_v24, 0.0  ;;  %v1017_v27 = vmul.f32 0.01, %v953_v24  ;;  %v3381_v3 = vmul.f32 %v885_v0, %v3152_v12  ;;  %v923_v4 = vadd.f32 %v3348_v25, %v888_v21 }
 0x1be   : > { %v3385_v5 = vmul.f32 %v885_v0, %v3154_v13  ;;  %v3388_v6 = vmul.f32 %v885_v0, %v3156_v14  ;;  %v3391_v7 = vmul.f32 %v885_v0, %v3166_v19  ;;  %v924_v8 = vadd.f32 %v3348_v25, %v889_v35 }
 0x1bf   : > { %v1049_v15 = vsel %vm985_vm8, %v953_v24, %v1017_v27  ;;  %v3395_v9 = vmul.f32 %v885_v0, %v3191_v47  ;;  %v3398_v10 = vmul.f32 %v885_v0, %v3213_v31  ;;  %v3401_v11 = vmul.f32 %v885_v0, %v3235_v17 }
 0x1c0   : > { %1158 = vst.msk [vmem:[#allocation2 + $0x231] sm:$0xff] %vm688_vm2, %v1049_v15  ;;  %v925_v12 = vadd.f32 %v3348_v25, %v890_v22  ;;  %v3405_v13 = vmul.f32 %v885_v0, %v3257_v45  ;;  %v3408_v14 = vmul.f32 %v885_v0, %v3279_v34  ;;  %v926_v19 = vadd.f32 %v3348_v25, %v891_v30 }
 0x1c1   : > { %v986_v39 = vmul.f32 0.01, %v922_v53  ;;  %v3412_v47 = vmul.f32 %v885_v0, %v3303_v23  ;;  %v927_v31 = vadd.f32 %v3348_v25, %v892_v58  ;;  %vm954_vm9 = vcmp.ge.f32.partialorder %v922_v53, 0.0 }
 0x1c2   : > { %v987_v41 = vmul.f32 0.01, %v923_v4  ;;  %v3416_v17 = vmul.f32 %v885_v0, %v3323_v16  ;;  %v928_v59 = vadd.f32 %v3348_v25, %v893_v33  ;;  %vm955_vm10 = vcmp.ge.f32.partialorder %v923_v4, 0.0 }
 0x1c3   : > { %v988_v45 = vmul.f32 0.01, %v924_v8  ;;  %v3420_v34 = vmul.f32 %v885_v0, %v3291_v57  ;;  %v929_v44 = vadd.f32 %v3348_v25, %v894_v36  ;;  %vm956_vm11 = vcmp.ge.f32.partialorder %v924_v8, 0.0  ;;  %v1168_v36 = vld [vmem:[%s4016_s4] sm:$0xff] }
 0x1c4   : > { %v989_v1 = vmul.f32 0.01, %v925_v12  ;;  %v930_v23 = vadd.f32 %v3348_v25, %v895_v37  ;;  %vm957_vm12 = vcmp.ge.f32.partialorder %v925_v12, 0.0  ;;  %v990_v42 = vmul.f32 0.01, %v926_v19  ;;  %v1170_v37 = vld [vmem:[#allocation2 + $0x121] sm:$0xff]  ;;  %1283 = vmatpush.msra.mxu2 %v1168_v36  ;;  %2614 = vmatpush.msra.mxu3 %v1168_v36 }
 0x1c5   : > { %v1018_v51 = vsel %vm954_vm9, %v922_v53, %v986_v39  ;;  %v931_v54 = vadd.f32 %v3348_v25, %v896_v38  ;;  %vm958_vm13 = vcmp.ge.f32.partialorder %v926_v19, 0.0  ;;  %v991_v16 = vmul.f32 0.01, %v927_v31  ;;  %2516 = vmatmul.msk.f32.vlgmr.msra.gmra.mxu1 %vm688_vm2, %v1170_v37 }
 0x1c6   : > { %v1019_v62 = vsel %vm955_vm10, %v923_v4, %v987_v41  ;;  %v932_v63 = vadd.f32 %v3348_v25, %v897_v26  ;;  %vm959_vm14 = vcmp.ge.f32.partialorder %v927_v31, 0.0  ;;  %v992_v18 = vmul.f32 0.01, %v928_v59  ;;  %1124 = vst.msk [vmem:[#allocation2 + $0x11] sm:$0xff] %vm688_vm2, %v1018_v51 }
 0x1c7   : > { %v1020_v57 = vsel %vm956_vm11, %v924_v8, %v988_v45  ;;  %v933_v0 = vadd.f32 %v3348_v25, %v898_v28  ;;  %vm960_vm15 = vcmp.ge.f32.partialorder %v928_v59, 0.0  ;;  %v993_v20 = vmul.f32 0.01, %v929_v44  ;;  %1125 = vst.msk [vmem:[#allocation2 + $0x21] sm:$0xff] %vm688_vm2, %v1019_v62 }
 0x1c8   : > { %v1021_v24 = vsel %vm957_vm12, %v925_v12, %v989_v1  ;;  %v934_v27 = vadd.f32 %v3348_v25, %v899_v40  ;;  %vm961_vm3 = vcmp.ge.f32.partialorder %v929_v44, 0.0  ;;  %v994_v15 = vmul.f32 0.01, %v930_v23  ;;  %1126 = vst.msk [vmem:[#allocation2 + $0x31] sm:$0xff] %vm688_vm2, %v1020_v57  ;;  %v1160_v40 = vld [vmem:[#allocation2 + $0x1b0] sm:$0xff] }
 0x1c9   : > { %v1022_v29 = vsel %vm958_vm13, %v926_v19, %v990_v42  ;;  %v935_v21 = vadd.f32 %v3348_v25, %v900_v43  ;;  %vm962_vm4 = vcmp.ge.f32.partialorder %v930_v23, 0.0  ;;  %v995_v35 = vmul.f32 0.01, %v931_v54  ;;  %1127 = vst.msk [vmem:[#allocation2 + $0x41] sm:$0xff] %vm688_vm2, %v1021_v24  ;;  %2524 = vmatmul.msk.f32.vlgmr.msra.gmra.mxu2 %vm688_vm2, %v1160_v40 }
 0x1ca   : > { %v1023_v22 = vsel %vm959_vm14, %v927_v31, %v991_v16  ;;  %v936_v30 = vadd.f32 %v3348_v25, %v901_v46  ;;  %vm963_vm5 = vcmp.ge.f32.partialorder %v931_v54, 0.0  ;;  %v996_v58 = vmul.f32 0.01, %v932_v63  ;;  %1128 = vst.msk [vmem:[#allocation2 + $0x51] sm:$0xff] %vm688_vm2, %v1022_v29 }
 0x1cb   : > { %v1024_v33 = vsel %vm960_vm15, %v928_v59, %v992_v18  ;;  %v937_v38 = vadd.f32 %v3348_v25, %v3368_v49  ;;  %vm964_vm6 = vcmp.ge.f32.partialorder %v932_v63, 0.0  ;;  %v997_v26 = vmul.f32 0.01, %v933_v0  ;;  %1129 = vst.msk [vmem:[#allocation2 + $0x61] sm:$0xff] %vm688_vm2, %v1023_v22 }
 0x1cc   : > { %v1025_v28 = vsel %vm961_vm3, %v929_v44, %v993_v20  ;;  %v938_v43 = vadd.f32 %v3348_v25, %v3371_v50  ;;  %vm965_vm7 = vcmp.ge.f32.partialorder %v933_v0, 0.0  ;;  %v998_v46 = vmul.f32 0.01, %v934_v27  ;;  %1130 = vst.msk [vmem:[#allocation2 + $0x71] sm:$0xff] %vm688_vm2, %v1024_v33 }
 0x1cd   : > { %v1026_v53 = vsel %vm962_vm4, %v930_v23, %v994_v15  ;;  %v939_v4 = vadd.f32 %v3348_v25, %v3375_v56  ;;  %vm966_vm8 = vcmp.ge.f32.partialorder %v934_v27, 0.0  ;;  %v999_v49 = vmul.f32 0.01, %v935_v21  ;;  %1131 = vst.msk [vmem:[#allocation2 + $0x81] sm:$0xff] %vm688_vm2, %v1025_v28 }
 0x1ce   : > { %v1027_v8 = vsel %vm963_vm5, %v931_v54, %v995_v35  ;;  %v940_v50 = vadd.f32 %v3348_v25, %v3378_v61  ;;  %vm967_vm9 = vcmp.ge.f32.partialorder %v935_v21, 0.0  ;;  %v1000_v12 = vmul.f32 0.01, %v936_v30  ;;  %1133 = vst.msk [vmem:[#allocation2 + $0xa1] sm:$0xff] %vm688_vm2, %v1026_v53 }
 0x1cf   : > { %v1028_v19 = vsel %vm964_vm6, %v932_v63, %v996_v58  ;;  %v941_v56 = vadd.f32 %v3348_v25, %v3381_v3  ;;  %vm968_vm10 = vcmp.ge.f32.partialorder %v936_v30, 0.0  ;;  %v1001_v39 = vmul.f32 0.01, %v937_v38  ;;  %1134 = vst.msk [vmem:[#allocation2 + $0xb1] sm:$0xff] %vm688_vm2, %v1027_v8  ;;  %v1481_v8 = vld [vmem:[%s4016_s4 + $0x20] sm:$0xff] }
 0x1d0   : > { %v1029_v31 = vsel %vm965_vm7, %v933_v0, %v997_v26  ;;  %v942_v61 = vadd.f32 %v3348_v25, %v3385_v5  ;;  %vm969_vm11 = vcmp.ge.f32.partialorder %v937_v38, 0.0  ;;  %v1002_v41 = vmul.f32 0.01, %v938_v43  ;;  %1135 = vst.msk [vmem:[#allocation2 + $0xc1] sm:$0xff] %vm688_vm2, %v1028_v19  ;;  %1521 = vmatpush.msrb.mxu2 %v1481_v8 }
 0x1d1   : > { %v1030_v59 = vsel %vm966_vm8, %v934_v27, %v998_v46  ;;  %v943_v45 = vadd.f32 %v3348_v25, %v3388_v6  ;;  %vm970_vm12 = vcmp.ge.f32.partialorder %v938_v43, 0.0  ;;  %v1003_v3 = vmul.f32 0.01, %v939_v4  ;;  %1136 = vst.msk [vmem:[#allocation2 + $0xd1] sm:$0xff] %vm688_vm2, %v1029_v31 }
 0x1d2   : > { %v1031_v44 = vsel %vm967_vm9, %v935_v21, %v999_v49  ;;  %v944_v1 = vadd.f32 %v3348_v25, %v3391_v7  ;;  %vm971_vm13 = vcmp.ge.f32.partialorder %v939_v4, 0.0  ;;  %v1004_v5 = vmul.f32 0.01, %v940_v50  ;;  %1137 = vst.msk [vmem:[#allocation2 + $0xe1] sm:$0xff] %vm688_vm2, %v1030_v59  ;;  %v1399_v49 = vld [vmem:[%s4016_s4 + $0x18] sm:$0xff] }
 0x1d3   : > { %v1032_v23 = vsel %vm968_vm10, %v936_v30, %v1000_v12  ;;  %v945_v42 = vadd.f32 %v3348_v25, %v3395_v9  ;;  %vm972_vm14 = vcmp.ge.f32.partialorder %v940_v50, 0.0  ;;  %v1005_v6 = vmul.f32 0.01, %v941_v56  ;;  %1138 = vst.msk [vmem:[#allocation2 + $0xf1] sm:$0xff] %vm688_vm2, %v1031_v44  ;;  %1439 = vmatpush.msrb.mxu1 %v1399_v49 }
 0x1d4   : > { %v1033_v51 = vsel %vm969_vm11, %v937_v38, %v1001_v39  ;;  %v946_v54 = vadd.f32 %v3348_v25, %v3398_v10  ;;  %vm973_vm15 = vcmp.ge.f32.partialorder %v941_v56, 0.0  ;;  %v1006_v7 = vmul.f32 0.01, %v942_v61  ;;  %1139 = vst.msk [vmem:[#allocation2 + $0x101] sm:$0xff] %vm688_vm2, %v1032_v23  ;;  %v1473_v23 = vld [vmem:[#allocation2 + $0x11] sm:$0xff] }
 0x1d5   : > { %v1034_v16 = vsel %vm970_vm12, %v938_v43, %v1002_v41  ;;  %v947_v62 = vadd.f32 %v3348_v25, %v3401_v11  ;;  %vm974_vm3 = vcmp.ge.f32.partialorder %v942_v61, 0.0  ;;  %v1007_v9 = vmul.f32 0.01, %v943_v45  ;;  %1140 = vst.msk [vmem:[#allocation2 + $0x111] sm:$0xff] %vm688_vm2, %v1033_v51  ;;  %v1317_v43 = vld [vmem:[%s4016_s4 + $0x10] sm:$0xff]  ;;  %v1474_v51 = vld [vmem:[#allocation2 + $0x21] sm:$0xff] }
 0x1d6   : > { %v1035_v63 = vsel %vm971_vm13, %v939_v4, %v1003_v3  ;;  %v948_v18 = vadd.f32 %v3348_v25, %v3405_v13  ;;  %vm975_vm4 = vcmp.ge.f32.partialorder %v943_v45, 0.0  ;;  %v1008_v10 = vmul.f32 0.01, %v944_v1  ;;  %1142 = vst.msk [vmem:[#allocation2 + $0x131] sm:$0xff] %vm688_vm2, %v1034_v16  ;;  %v1309_v3 = vld [vmem:[#allocation2 + $0x1b1] sm:$0xff] }
 0x1d7   : > { %v1036_v57 = vsel %vm972_vm14, %v940_v50, %v1004_v5  ;;  %v949_v0 = vadd.f32 %v3348_v25, %v3408_v14  ;;  %vm976_vm5 = vcmp.ge.f32.partialorder %v944_v1, 0.0  ;;  %v1009_v11 = vmul.f32 0.01, %v945_v42  ;;  %1143 = vst.msk [vmem:[#allocation2 + $0x141] sm:$0xff] %vm688_vm2, %v1035_v63  ;;  %v1475_v16 = vld [vmem:[#allocation2 + $0x31] sm:$0xff] }
 0x1d8   : > { %v1037_v20 = vsel %vm973_vm15, %v941_v56, %v1005_v6  ;;  %v950_v24 = vadd.f32 %v3348_v25, %v3412_v47  ;;  %vm977_vm6 = vcmp.ge.f32.partialorder %v945_v42, 0.0  ;;  %v1010_v13 = vmul.f32 0.01, %v946_v54  ;;  %1144 = vst.msk [vmem:[#allocation2 + $0x151] sm:$0xff] %vm688_vm2, %v1036_v57  ;;  %v1563_v56 = vld [vmem:[%s4016_s4 + $0x28] sm:$0xff]  ;;  %v1809_v57 = vld [vmem:[%s4016_s4 + $0x40] sm:$0xff] }
 0x1d9   : > { %v1038_v27 = vsel %vm974_vm3, %v942_v61, %v1006_v7  ;;  %v951_v15 = vadd.f32 %v3348_v25, %v3416_v17  ;;  %vm978_vm7 = vcmp.ge.f32.partialorder %v946_v54, 0.0  ;;  %v1011_v14 = vmul.f32 0.01, %v947_v62  ;;  %1145 = vst.msk [vmem:[#allocation2 + $0x161] sm:$0xff] %vm688_vm2, %v1037_v20  ;;  %v1477_v20 = vld [vmem:[#allocation2 + $0x51] sm:$0xff] }
 0x1da   : > { %v1039_v29 = vsel %vm975_vm4, %v943_v45, %v1007_v9  ;;  %v952_v21 = vadd.f32 %v3348_v25, %v3420_v34  ;;  %vm979_vm8 = vcmp.ge.f32.partialorder %v947_v62, 0.0  ;;  %v1012_v47 = vmul.f32 0.01, %v948_v18  ;;  %1146 = vst.msk [vmem:[#allocation2 + $0x171] sm:$0xff] %vm688_vm2, %v1038_v27  ;;  %v1727_v9 = vld [vmem:[%s4016_s4 + $0x38] sm:$0xff]  ;;  %v1478_v27 = vld [vmem:[#allocation2 + $0x61] sm:$0xff] }
 0x1db   : > { %v1040_v35 = vsel %vm976_vm5, %v944_v1, %v1008_v10  ;;  %vm980_vm9 = vcmp.ge.f32.partialorder %v948_v18, 0.0  ;;  %v1013_v22 = vmul.f32 0.01, %v949_v0  ;;  %v1041_v30 = vsel %vm977_vm6, %v945_v42, %v1009_v11  ;;  %1147 = vst.msk [vmem:[#allocation2 + $0x181] sm:$0xff] %vm688_vm2, %v1039_v29  ;;  %v1391_v1 = vld [vmem:[#allocation2 + $0xa0] sm:$0xff]  ;;  %v1392_v42 = vld [vmem:[#allocation2 + $0xb0] sm:$0xff]  ;;  %1767 = vmatpush.msra.mxu2 %v1727_v9 }
 0x1dc   : > { %vm981_vm10 = vcmp.ge.f32.partialorder %v949_v0, 0.0  ;;  %v1014_v17 = vmul.f32 0.01, %v950_v24  ;;  %v1042_v58 = vsel %vm978_vm7, %v946_v54, %v1010_v13  ;;  %vm982_vm11 = vcmp.ge.f32.partialorder %v950_v24, 0.0  ;;  %1148 = vst.msk [vmem:[#allocation2 + $0x191] sm:$0xff] %vm688_vm2, %v1040_v35  ;;  %v1393_v54 = vld [vmem:[#allocation2 + $0xc0] sm:$0xff] }
 0x1dd   : > { %v1015_v33 = vmul.f32 0.01, %v951_v15  ;;  %v1043_v25 = vsel %vm979_vm8, %v947_v62, %v1011_v14  ;;  %vm983_vm12 = vcmp.ge.f32.partialorder %v951_v15, 0.0  ;;  %v1016_v34 = vmul.f32 0.01, %v952_v21  ;;  %1149 = vst.msk [vmem:[#allocation2 + $0x1a1] sm:$0xff] %vm688_vm2, %v1041_v30 }
 0x1de   : > { %v1044_v36 = vsel %vm980_vm9, %v948_v18, %v1012_v47  ;;  %v3510_v37 = vld [vmem:[#allocation2 + $0x131] sm:$0xff]  ;;  %vm984_vm13 = vcmp.ge.f32.partialorder %v952_v21, 0.0  ;;  %v1045_v38 = vsel %vm981_vm10, %v949_v0, %v1013_v22  ;;  %1151 = vst.msk [vmem:[#allocation2 + $0x1c1] sm:$0xff] %vm688_vm2, %v1042_v58  ;;  %v1046_v26 = vsel %vm982_vm11, %v950_v24, %v1014_v17  ;;  %v3530_v4 = vld [vmem:[#allocation2 + $0x141] sm:$0xff] }
 0x1df   : > { %2517 = vmatmul.msk.f32.gmra.mxu1 %vm688_vm2, %v3510_v37  ;;  %1152 = vst.msk [vmem:[#allocation2 + $0x1d1] sm:$0xff] %vm688_vm2, %v1043_v25  ;;  %v1047_v28 = vsel %vm983_vm12, %v951_v15, %v1015_v33  ;;  %v1048_v40 = vsel %vm984_vm13, %v952_v21, %v1016_v34  ;;  %v3548_v19 = vld [vmem:[#allocation2 + $0x151] sm:$0xff]  ;;  %v1476_v18 = vld [vmem:[#allocation2 + $0x41] sm:$0xff]  ;;  %vm2109_vm11 = vcmask 130048  }
 0x1e0   : > { %1153 = vst.msk [vmem:[#allocation2 + $0x1e1] sm:$0xff] %vm688_vm2, %v1044_v36  ;;  %v3563_v61 = vld [vmem:[#allocation2 + $0x161] sm:$0xff]  ;;  %v1394_v62 = vld [vmem:[#allocation2 + $0xd0] sm:$0xff] }
 0x1e1   : > { %1154 = vst.msk [vmem:[#allocation2 + $0x1f1] sm:$0xff] %vm688_vm2, %v1045_v38  ;;  %v3575_v45 = vld [vmem:[#allocation2 + $0x171] sm:$0xff]  ;;  %v1395_v10 = vld [vmem:[#allocation2 + $0xe0] sm:$0xff] }
 0x1e2   : > { %1155 = vst.msk [vmem:[#allocation2 + $0x201] sm:$0xff] %vm688_vm2, %v1046_v26  ;;  %v3522_v46 = vld [vmem:[#allocation2 + $0x181] sm:$0xff]  ;;  %v1645_v0 = vld [vmem:[%s4016_s4 + $0x30] sm:$0xff] }
 0x1e3   : > { %1156 = vst.msk [vmem:[#allocation2 + $0x211] sm:$0xff] %vm688_vm2, %v1047_v28  ;;  %2522 = vmatmul.msk.f32.vlgmr.msrb.gmra.mxu3 %vm688_vm2, %v3522_v46  ;;  %v3542_v50 = vld [vmem:[#allocation2 + $0x191] sm:$0xff]  ;;  %1685 = vmatpush.msra.mxu1 %v1645_v0  ;;  %v1397_v15 = vld [vmem:[#allocation2 + $0x100] sm:$0xff] }
 0x1e4   : > { %1157 = vst.msk [vmem:[#allocation2 + $0x221] sm:$0xff] %vm688_vm2, %v1048_v40  ;;  %1357 = vmatpush.msrb.mxu3 %v1317_v43  ;;  %v1396_v24 = vld [vmem:[#allocation2 + $0xf0] sm:$0xff]  ;;  %v1555_v47 = vld [vmem:[#allocation2 + $0xa1] sm:$0xff] }
 0x1e5   : > { %v3528_v53 = vld [vmem:[#allocation2 + $0x1c0] sm:$0xff]  ;;  %v1479_v29 = vld [vmem:[#allocation2 + $0x71] sm:$0xff] }
 0x1e6   : > { %2525 = vmatmul.msk.f32.gmra.mxu2 %vm688_vm2, %v3528_v53  ;;  %v3546_v12 = vld [vmem:[#allocation2 + $0x1d0] sm:$0xff]  ;;  %v3587_v5 = vld [vmem:[#allocation2 + $0x1c1] sm:$0xff] }
 0x1e7   : > { %2518 = vmatmul.msk.f32.gmra.mxu1 %vm688_vm2, %v3530_v4  ;;  %v3561_v31 = vld [vmem:[#allocation2 + $0x1e0] sm:$0xff]  ;;  %v3593_v6 = vld [vmem:[#allocation2 + $0x1d1] sm:$0xff] }
 0x1e8   : > { %v3573_v59 = vld [vmem:[#allocation2 + $0x1f0] sm:$0xff]  ;;  %v3599_v7 = vld [vmem:[#allocation2 + $0x1e1] sm:$0xff] }
 0x1e9   : > { %v3582_v44 = vld [vmem:[#allocation2 + $0x200] sm:$0xff]  ;;  %v3608_v63 = vld [vmem:[#allocation2 + $0x1f1] sm:$0xff] }
 0x1ea   : > { %v3557_v39 = vld [vmem:[#allocation2 + $0x210] sm:$0xff]  ;;  %v3620_v11 = vld [vmem:[#allocation2 + $0x201] sm:$0xff] }
 0x1eb   : > { %2523 = vmatmul.msk.f32.gmra.mxu3 %vm688_vm2, %v3542_v50  ;;  %v3569_v41 = vld [vmem:[#allocation2 + $0x220] sm:$0xff]  ;;  %v3626_v13 = vld [vmem:[#allocation2 + $0x211] sm:$0xff] }
 0x1ec   : > { %v3632_v14 = vld [vmem:[#allocation2 + $0x221] sm:$0xff]  ;;  %v1398_v21 = vld [vmem:[#allocation2 + $0x110] sm:$0xff] }
 0x1ed   : > { %v1480_v35 = vld [vmem:[#allocation2 + $0x81] sm:$0xff]  ;;  %v1556_v22 = vld [vmem:[#allocation2 + $0xb1] sm:$0xff] }
 0x1ee   : > { %2526 = vmatmul.msk.f32.gmra.mxu2 %vm688_vm2, %v3546_v12  ;;  %v1557_v17 = vld [vmem:[#allocation2 + $0xc1] sm:$0xff]  ;;  %v1558_v58 = vld [vmem:[#allocation2 + $0xd1] sm:$0xff] }
 0x1ef   : > { %2519 = vmatmul.msk.f32.gmra.mxu1 %vm688_vm2, %v3548_v19  ;;  %v1559_v34 = vld [vmem:[#allocation2 + $0xe1] sm:$0xff]  ;;  %v1560_v26 = vld [vmem:[#allocation2 + $0xf1] sm:$0xff] }
 0x1f3   : > { %2530 = vmatmul.msk.f32.vlgmr.msra.gmra.mxu3 %vm688_vm2, %v3557_v39 }
 0x1f4   : > { %1603 = vmatpush.msra.mxu3 %v1563_v56 }
 0x1f6   : > { %2527 = vmatmul.msk.f32.gmra.mxu2 %vm688_vm2, %v3561_v31 }
 0x1f7   : > { %2520 = vmatmul.msk.f32.gmra.mxu1 %vm688_vm2, %v3563_v61 }
 0x1fb   : > { %2531 = vmatmul.msk.f32.gmra.mxu3 %vm688_vm2, %v3569_v41 }
 0x1fe   : > { %2528 = vmatmul.msk.f32.gmra.mxu2 %vm688_vm2, %v3573_v59 }
 0x1ff   : > { %2521 = vmatmul.msk.f32.gmra.mxu1 %vm688_vm2, %v3575_v45 }
 0x203   : > { %2532 = vmatmul.msk.f32.vlgmr.msrb.gmra.mxu3 %vm688_vm2, %v1309_v3 }
 0x204   : > { %1849 = vmatpush.msrb.mxu3 %v1809_v57 }
 0x206   : > { %2529 = vmatmul.msk.f32.gmra.mxu2 %vm688_vm2, %v3582_v44 }
 0x207   : > { %2540 = vmatmul.msk.f32.vlgmr.msrb.gmra.mxu1 %vm688_vm2, %v1391_v1 }
 0x20b   : > { %2533 = vmatmul.msk.f32.gmra.mxu3 %vm688_vm2, %v3587_v5 }
 0x20e   : > { %2548 = vmatmul.msk.f32.vlgmr.msrb.gmra.mxu2 %vm688_vm2, %v1473_v23 }
 0x20f   : > { %2541 = vmatmul.msk.f32.gmra.mxu1 %vm688_vm2, %v1392_v42 }
 0x213   : > { %2534 = vmatmul.msk.f32.gmra.mxu3 %vm688_vm2, %v3593_v6 }
 0x216   : > { %2549 = vmatmul.msk.f32.gmra.mxu2 %vm688_vm2, %v1474_v51 }
 0x217   : > { %2542 = vmatmul.msk.f32.gmra.mxu1 %vm688_vm2, %v1393_v54 }
 0x21b   : > { %2535 = vmatmul.msk.f32.gmra.mxu3 %vm688_vm2, %v3599_v7 }
 0x21e   : > { %2550 = vmatmul.msk.f32.gmra.mxu2 %vm688_vm2, %v1475_v16 }
 0x21f   : > { %2543 = vmatmul.msk.f32.gmra.mxu1 %vm688_vm2, %v1394_v62 }
 0x223   : > { %2536 = vmatmul.msk.f32.gmra.mxu3 %vm688_vm2, %v3608_v63 }
 0x226   : > { %2551 = vmatmul.msk.f32.gmra.mxu2 %vm688_vm2, %v1476_v18 }
 0x227   : > { %2544 = vmatmul.msk.f32.gmra.mxu1 %vm688_vm2, %v1395_v10 }
 0x22b   : > { %2537 = vmatmul.msk.f32.gmra.mxu3 %vm688_vm2, %v3620_v11 }
 0x22e   : > { %2552 = vmatmul.msk.f32.gmra.mxu2 %vm688_vm2, %v1477_v20 }
 0x22f   : > { %2545 = vmatmul.msk.f32.gmra.mxu1 %vm688_vm2, %v1396_v24 }
 0x233   : > { %2538 = vmatmul.msk.f32.gmra.mxu3 %vm688_vm2, %v3626_v13 }
 0x236   : > { %2553 = vmatmul.msk.f32.gmra.mxu2 %vm688_vm2, %v1478_v27 }
 0x237   : > { %2546 = vmatmul.msk.f32.gmra.mxu1 %vm688_vm2, %v1397_v15 }
 0x23b   : > { %2539 = vmatmul.msk.f32.gmra.mxu3 %vm688_vm2, %v3632_v14 }
 0x23e   : > { %2554 = vmatmul.msk.f32.gmra.mxu2 %vm688_vm2, %v1479_v29 }
 0x23f   : > { %2547 = vmatmul.msk.f32.gmra.mxu1 %vm688_vm2, %v1398_v21 }
 0x242   : > { %v1220_v30 = vpop.f32.mrf.mxu1 }
 0x243   : > { %2556 = vmatmul.msk.f32.vlgmr.msra.gmra.mxu3 %vm688_vm2, %v1555_v47 }
 0x246   : > { %2555 = vmatmul.msk.f32.gmra.mxu2 %vm688_vm2, %v1480_v35 }
 0x247   : > { %2564 = vmatmul.msk.f32.vlgmr.msra.gmra.mxu1 %vm688_vm2, %v3528_v53  ;;  %v1561_v53 = vld [vmem:[#allocation2 + $0x101] sm:$0xff] }
 0x24b   : > { %2557 = vmatmul.msk.f32.gmra.mxu3 %vm688_vm2, %v1556_v22 }
 0x24c   : > { %v1285_v25 = vpop.f32.mrf.mxu2 }
 0x24e   : > { %2572 = vmatmul.msk.f32.vlgmr.msra.gmra.mxu2 %vm688_vm2, %v3510_v37 }
 0x24f   : > { %2565 = vmatmul.msk.f32.gmra.mxu1 %vm688_vm2, %v3546_v12 }
 0x253   : > { %2558 = vmatmul.msk.f32.gmra.mxu3 %vm688_vm2, %v1557_v17 }
 0x256   : > { %2573 = vmatmul.msk.f32.gmra.mxu2 %vm688_vm2, %v3530_v4 }
 0x257   : > { %2566 = vmatmul.msk.f32.gmra.mxu1 %vm688_vm2, %v3561_v31 }
 0x25b   : > { %2559 = vmatmul.msk.f32.gmra.mxu3 %vm688_vm2, %v1558_v58 }
 0x25c   : > { %v1223_v33 = vpop.f32.mrf.mxu1 }
 0x25e   : > { %2574 = vmatmul.msk.f32.gmra.mxu2 %vm688_vm2, %v3548_v19  ;;  %v1562_v19 = vld [vmem:[#allocation2 + $0x111] sm:$0xff] }
 0x25f   : > { %2567 = vmatmul.msk.f32.gmra.mxu1 %vm688_vm2, %v3573_v59  ;;  %v1286_v59 = vadd.f32 %v1285_v25, %v1220_v30 }
 0x263   : > { %2560 = vmatmul.msk.f32.gmra.mxu3 %vm688_vm2, %v1559_v34 }
 0x264   : > { %v1226_v36 = vpop.f32.mrf.mxu1 }
 0x266   : > { %2575 = vmatmul.msk.f32.gmra.mxu2 %vm688_vm2, %v3563_v61  ;;  %v1238_v37 = vpop.f32.mrf.mxu3 }
 0x267   : > { %2568 = vmatmul.msk.f32.gmra.mxu1 %vm688_vm2, %v3582_v44 }
 0x269   : > { %v1288_v38 = vpop.f32.mrf.mxu2 }
 0x26a   : > { %v1289_v42 = vadd.f32 %v1288_v38, %v1223_v33 }
 0x26b   : > { %2561 = vmatmul.msk.f32.gmra.mxu3 %vm688_vm2, %v1560_v26 }
 0x26c   : > { %v1229_v28 = vpop.f32.mrf.mxu1 }
 0x26e   : > { %2576 = vmatmul.msk.f32.gmra.mxu2 %vm688_vm2, %v3575_v45  ;;  %v1241_v40 = vpop.f32.mrf.mxu3  ;;  %v1726_v45 = vld [vmem:[#allocation2 + $0x1a1] sm:$0xff] }
 0x26f   : > { %2569 = vmatmul.msk.f32.gmra.mxu1 %vm688_vm2, %v3557_v39  ;;  %v1644_v39 = vld [vmem:[#allocation2 + $0x230] sm:$0xff] }
 0x271   : > { %v1291_v43 = vpop.f32.mrf.mxu2 }
 0x272   : > { %v1292_v18 = vadd.f32 %v1291_v43, %v1226_v36 }
 0x273   : > { %2562 = vmatmul.msk.f32.gmra.mxu3 %vm688_vm2, %v1561_v53 }
 0x274   : > { %v1232_v4 = vpop.f32.mrf.mxu1 }
 0x276   : > { %2577 = vmatmul.msk.f32.gmra.mxu2 %vm688_vm2, %v3522_v46  ;;  %v1303_v49 = vpop.f32.mrf.mxu3 }
 0x277   : > { %2570 = vmatmul.msk.f32.gmra.mxu1 %vm688_vm2, %v3569_v41  ;;  %v3672_v8 = vadd.f32 %v1303_v49, %v1238_v37 }
 0x279   : > { %v1294_v12 = vpop.f32.mrf.mxu2 }
 0x27a   : > { %v1295_v27 = vadd.f32 %v1294_v12, %v1229_v28  ;;  %v1808_v12 = vld [vmem:[#allocation2 + $0x231] sm:$0xff] }
 0x27b   : > { %2563 = vmatmul.msk.f32.gmra.mxu3 %vm688_vm2, %v1562_v19 }
 0x27c   : > { %v1235_v56 = vpop.f32.mrf.mxu1 }
 0x27e   : > { %2578 = vmatmul.msk.f32.gmra.mxu2 %vm688_vm2, %v3542_v50  ;;  %v1306_v31 = vpop.f32.mrf.mxu3 }
 0x27f   : > { %2571 = vmatmul.msk.f32.gmra.mxu1 %vm688_vm2, %v1644_v39  ;;  %v1307_v61 = vadd.f32 %v1306_v31, %v1241_v40 }
 0x281   : > { %v1297_v46 = vpop.f32.mrf.mxu2 }
 0x282   : > { %v1298_v22 = vadd.f32 %v1297_v46, %v1232_v4 }
 0x283   : > { %2580 = vmatmul.msk.f32.vlgmr.msrb.gmra.mxu3 %vm688_vm2, %v3587_v5 }
 0x284   : > { %v1441_v41 = vpop.f32.mrf.mxu1 }
 0x286   : > { %2579 = vmatmul.msk.f32.gmra.mxu2 %vm688_vm2, %v1726_v45  ;;  %v1359_v3 = vpop.f32.mrf.mxu3 }
 0x287   : > { %v1383_v44 = vadd.f32 %v1359_v3, %v1286_v59 }
 0x289   : > { %v1300_v1 = vpop.f32.mrf.mxu2  ;;  %v1465_v23 = vadd.f32 %v1441_v41, %v1383_v44 }
 0x28a   : > { %v1301_v34 = vadd.f32 %v1300_v1, %v1235_v56 }
 0x28b   : > { %2581 = vmatmul.msk.f32.gmra.mxu3 %vm688_vm2, %v3593_v6 }
 0x28c   : > { %v1444_v50 = vpop.f32.mrf.mxu1 }
 0x28e   : > { %v1362_v51 = vpop.f32.mrf.mxu3 }
 0x28f   : > { %v1384_v54 = vadd.f32 %v1362_v51, %v1289_v42  ;;  %v2030_v51 = vmul.f32 0.25, %v3077_v48 }
 0x291   : > { %v1523_v16 = vpop.f32.mrf.mxu2  ;;  %v1466_v62 = vadd.f32 %v1444_v50, %v1384_v54 }
 0x292   : > { %v1547_v9 = vadd.f32 %v1523_v16, %v1465_v23 }
 0x293   : > { %2582 = vmatmul.msk.f32.gmra.mxu3 %vm688_vm2, %v3599_v7 }
 0x294   : > { %v1447_v5 = vpop.f32.mrf.mxu1 }
 0x296   : > { %v1365_v10 = vpop.f32.mrf.mxu3 }
 0x297   : > { %v1385_v57 = vadd.f32 %v1365_v10, %v1292_v18 }
 0x299   : > { %v1526_v0 = vpop.f32.mrf.mxu2  ;;  %v1467_v20 = vadd.f32 %v1447_v5, %v1385_v57 }
 0x29a   : > { %v1548_v24 = vadd.f32 %v1526_v0, %v1466_v62  ;;  %v2038_v62 = vld [vmem:[%s4022_s10] sm:$0xf]  ;;  %v2671_v0 = vld [vmem:[%s2869_s15 + $0xc8] sm:$0xff]  ;;  %s2611_s15 = sshll.u32 %s2832_s29, 6  ;;  %s433_s29 = scalar_lea.vmem [#allocation3], %s2480_s21 }
 0x29b   : > { %2583 = vmatmul.msk.f32.gmra.mxu3 %vm688_vm2, %v3608_v63  ;;  %2588 = vmatpush.msk.msrb.mxu1 %vm569_vm0, %v2038_v62  ;;  %v2023_v48 = vadd.f32 %v2671_v0, %v3002_v32  ;;  %v2034_v32 = vmul.f32 0.25, %v3116_v60  ;;  %v2035_v60 = vmul.f32 0.25, %v3128_v2  ;;  %s2410_s24 = scalar_lea.hbm %s4025_s13, %s2611_s15  ;;  %s2411_s30 = sshll.u32 %s433_s29, 4  ;;  %s2412_s30 = int_to_ptr.vmem [resolvable:$true] %s2411_s30 }
 0x29c   : > { %v1450_v6 = vpop.f32.mrf.mxu1  ;;  %2589 = vmatmul.msk.f32.vlgmr.msrb.gmra.mxu1 %vm472_vm1, %v2030_v51  ;;  %s2413_s16 = sshll.u32 %s2410_s24, 4  ;;  %s2399_s21 = scalar_lea.sflag [#allocation4], %s431_s20  ;;  %s2414_s16 = int_to_ptr.hbm [resolvable:$true] %s2413_s16 }
 0x29d   : > { %s2686_s15 = sshra.s32 %s2414_s16, 4  ;;  %s2687_s15 = int_to_ptr.hbm [resolvable:$true] %s2686_s15 }
 0x29e   : > { %v1368_v15 = vpop.f32.mrf.mxu3  ;;  %s2688_s22 = scalar_lea.hbm %s2687_s15, 64  ;;  %p2693_p0 = scmp.lt.s32.totalorder %s2687_s15, %s4025_s13 }
 0x29f   : > { %v1386_v29 = vadd.f32 %v1368_v15, %v1295_v27  ;;  %v2032_v15 = vmul.f32 0.25, %v3100_v52  ;;  %p2689_p11 = scmp.ne.s32.totalorder %s2687_s15, %s2688_s22  ;;  %p2694_p1 = scmp.lt.s32.totalorder %s2692_s0, %s2688_s22 }
 0x2a1   : > { %v1529_v21 = vpop.f32.mrf.mxu2  ;;  %v1468_v47 = vadd.f32 %v1450_v6, %v1386_v29  ;;  %p2690_p12 = pnand %p2689_p11, %p2849_p5  ;;  %p2695_p2 = por %p2694_p1, %p2693_p0 }
 0x2a2   : > { %v1549_v35 = vadd.f32 %v1529_v21, %v1467_v20  ;;  %v2031_v20 = vmul.f32 0.25, %v2023_v48 }
 0x2a3   : > { %2584 = vmatmul.msk.f32.gmra.mxu3 %vm688_vm2, %v3620_v11  ;;  %p2691_p13 = pneg %p2690_p12 }
 0x2a4   : > { %v1453_v7 = vpop.f32.mrf.mxu1  ;;  %2590 = vmatmul.msk.f32.gmra.mxu1 %vm472_vm1, %v2031_v20 }
 0x2a5   : > { %p2696_p3 = pnand %p2695_p2, %p2691_p13 }
 0x2a6   : > { %v1371_v30 = vpop.f32.mrf.mxu3 }
 0x2a7   : > { %v1387_v17 = vadd.f32 %v1371_v30, %v1298_v22 }
 0x2a9   : > { %v1532_v58 = vpop.f32.mrf.mxu2  ;;  %v1469_v33 = vadd.f32 %v1453_v7, %v1387_v17  ;;  %v2200_v17 = vld [vmem:[%s4019_s7] sm:$0xff] }
 0x2aa   : > { %v1550_v25 = vadd.f32 %v1532_v58, %v1468_v47  ;;  %2240 = vmatpush.msrb.mxu2 %v2200_v17 }
 0x2ab   : > { %2585 = vmatmul.msk.f32.gmra.mxu3 %vm688_vm2, %v3626_v13 }
 0x2ac   : > { %v1456_v63 = vpop.f32.mrf.mxu1  ;;  %2591 = vmatmul.msk.f32.gmra.mxu1 %vm472_vm1, %v2032_v15 }
 0x2ae   : > { %v1374_v36 = vpop.f32.mrf.mxu3 }
 0x2af   : > { %v1388_v37 = vadd.f32 %v1374_v36, %v1301_v34 }
 0x2b1   : > { %v1535_v38 = vpop.f32.mrf.mxu2  ;;  %v1470_v26 = vadd.f32 %v1456_v63, %v1388_v37 }
 0x2b2   : > { %v1551_v28 = vadd.f32 %v1535_v38, %v1469_v33 }
 0x2b3   : > { %2586 = vmatmul.msk.f32.gmra.mxu3 %vm688_vm2, %v3632_v14 }
 0x2b4   : > { %v1459_v40 = vpop.f32.mrf.mxu1 }
 0x2b6   : > { %v1377_v11 = vpop.f32.mrf.mxu3 }
 0x2b7   : > { %v1389_v43 = vadd.f32 %v1377_v11, %v3672_v8 }
 0x2b9   : > { %v1538_v53 = vpop.f32.mrf.mxu2  ;;  %v1471_v4 = vadd.f32 %v1459_v40, %v1389_v43 }
 0x2ba   : > { %v1552_v49 = vadd.f32 %v1538_v53, %v1470_v26 }
 0x2bb   : > { %2587 = vmatmul.msk.f32.gmra.mxu3 %vm688_vm2, %v1808_v12 }
 0x2bc   : > { %v3697_v23 = vpop.f32.mrf.mxu1 }
 0x2be   : > { %v1380_v13 = vpop.f32.mrf.mxu3 }
 0x2bf   : > { %v3695_v19 = vadd.f32 %v1380_v13, %v1307_v61 }
 0x2c1   : > { %v1541_v56 = vpop.f32.mrf.mxu2 }
 0x2c2   : > { %v1553_v39 = vadd.f32 %v1541_v56, %v1471_v4 }
 0x2c4   : > { %v1687_v54 = vpop.f32.mrf.mxu1 }
 0x2c6   : > { %v1605_v31 = vpop.f32.mrf.mxu3 }
 0x2c7   : > { %v1629_v46 = vadd.f32 %v1605_v31, %v1547_v9 }
 0x2c9   : > { %v3699_v50 = vpop.f32.mrf.mxu2  ;;  %v1711_v33 = vadd.f32 %v1687_v54, %v1629_v46 }
 0x2cc   : > { %v1690_v18 = vpop.f32.mrf.mxu1 }
 0x2ce   : > { %v1608_v59 = vpop.f32.mrf.mxu3 }
 0x2cf   : > { %v1630_v41 = vadd.f32 %v1608_v59, %v1548_v24 }
 0x2d1   : > { %v1769_v16 = vpop.f32.mrf.mxu2  ;;  %v1712_v58 = vadd.f32 %v1690_v18, %v1630_v41 }
 0x2d4   : > { %v1693_v24 = vpop.f32.mrf.mxu1 }
 0x2d6   : > { %v1611_v14 = vpop.f32.mrf.mxu3 }
 0x2d7   : > { %v1631_v45 = vadd.f32 %v1611_v14, %v1549_v35  ;;  %v2033_v35 = vmul.f32 0.25, %v3106_v55  ;;  %v1793_v55 = vadd.f32 %v1769_v16, %v1711_v33  ;;  %v4036_v14 = vld [vmem:[#allocation6_spill] sm:$0xff] }
 0x2d9   : > { %v1772_v10 = vpop.f32.mrf.mxu2  ;;  %2592 = vmatmul.msk.f32.gmra.mxu1 %vm472_vm1, %v2033_v35  ;;  %v1713_v63 = vadd.f32 %v1693_v24, %v1631_v45  ;;  %v2036_v45 = vmul.f32 0.25, %v4036_v14 }
 0x2dc   : > { %v1696_v21 = vpop.f32.mrf.mxu1 }
 0x2de   : > { %v1614_v3 = vpop.f32.mrf.mxu3 }
 0x2df   : > { %v1632_v44 = vadd.f32 %v1614_v3, %v1550_v25  ;;  %v1794_v25 = vadd.f32 %v1772_v10, %v1712_v58 }
 0x2e1   : > { %v1775_v27 = vpop.f32.mrf.mxu2  ;;  %2593 = vmatmul.msk.f32.gmra.mxu1 %vm472_vm1, %v2034_v32  ;;  %v1714_v36 = vadd.f32 %v1696_v21, %v1632_v44  ;;  %v1472_v32 = vadd.f32 %v3697_v23, %v3695_v19 }
 0x2e2   : > { %v1795_v34 = vadd.f32 %v1775_v27, %v1713_v63 }
 0x2e3   : > { %v1554_v33 = vadd.f32 %v3699_v50, %v1472_v32  ;;  %v1884_v32 = vld [vmem:[%s4018_s6] sm:$0x1] }
 0x2e4   : > { %v1699_v22 = vpop.f32.mrf.mxu1 }
 0x2e6   : > { %v1617_v8 = vpop.f32.mrf.mxu3 }
 0x2e7   : > { %v1633_v1 = vadd.f32 %v1617_v8, %v1551_v28 }
 0x2e9   : > { %v1778_v47 = vpop.f32.mrf.mxu2  ;;  %v1715_v26 = vadd.f32 %v1699_v22, %v1633_v1  ;;  %2594 = vmatmul.msk.f32.gmra.mxu1 %vm472_vm1, %v2035_v60 }
 0x2ea   : > { %v1796_v38 = vadd.f32 %v1778_v47, %v1714_v36 }
 0x2ec   : > { %v1702_v40 = vpop.f32.mrf.mxu1 }
 0x2ee   : > { %v1620_v42 = vpop.f32.mrf.mxu3 }
 0x2ef   : > { %v3701_v61 = vadd.f32 %v1620_v42, %v1552_v49 }
 0x2f1   : > { %v1781_v30 = vpop.f32.mrf.mxu2  ;;  %v1716_v3 = vadd.f32 %v1702_v40, %v3701_v61  ;;  %2595 = vmatmul.msk.f32.gmra.mxu1 %vm472_vm1, %v2036_v45 }
 0x2f2   : > { %v1797_v43 = vadd.f32 %v1781_v30, %v1715_v26 }
 0x2f4   : > { %v1705_v61 = vpop.f32.mrf.mxu1 }
 0x2f6   : > { %v1623_v9 = vpop.f32.mrf.mxu3 }
 0x2f7   : > { %v3709_v5 = vadd.f32 %v1623_v9, %v1553_v39 }
 0x2f9   : > { %v1784_v49 = vpop.f32.mrf.mxu2  ;;  %v1717_v30 = vadd.f32 %v1705_v61, %v3709_v5 }
 0x2fa   : > { %v1798_v62 = vadd.f32 %v1784_v49, %v1716_v3 }
 0x2fc   : > { %v1708_v36 = vpop.f32.mrf.mxu1 }
 0x2fe   : > { %v3711_v57 = vpop.f32.mrf.mxu3 }
 0x306   : > { %v1851_v6 = vpop.f32.mrf.mxu3 }
 0x307   : > { %v3728_v28 = vadd.f32 %v1851_v6, %v1793_v55  ;;  %v1787_v6 = vpop.f32.mrf.mxu2  ;;  %v1636_v55 = vadd.f32 %v3711_v57, %v1554_v33 }
 0x309   : > { %v1906_v13 = vmul.f32 %v3728_v28, %v3728_v28  ;;  %v1885_v31 = vsel %vm688_vm2, %v3728_v28, 0.0  ;;  %v1718_v26 = vadd.f32 %v1708_v36, %v1636_v55 }
 0x30b   : > { %v1914_v8 = vsel %vm688_vm2, %v1906_v13, 0.0 }
 0x30e   : > { %v1854_v29 = vpop.f32.mrf.mxu3 }
 0x30f   : > { %v3725_v37 = vadd.f32 %v1854_v29, %v1794_v25  ;;  %v1799_v25 = vadd.f32 %v1787_v6, %v1717_v30  ;;  %v1790_v60 = vpop.f32.mrf.mxu2 }
 0x311   : > { %v1907_v53 = vmul.f32 %v3725_v37, %v3725_v37  ;;  %v1886_v2 = vsel %vm688_vm2, %v3725_v37, 0.0 }
 0x312   : > { %v1887_v44 = vadd.f32 %v1886_v2, %v1885_v31 }
 0x313   : > { %v1915_v46 = vsel %vm688_vm2, %v1907_v53, 0.0 }
 0x314   : > { %v1916_v54 = vadd.f32 %v1915_v46, %v1914_v8 }
 0x316   : > { %v1857_v7 = vpop.f32.mrf.mxu3 }
 0x317   : > { %v3730_v11 = vadd.f32 %v1857_v7, %v1795_v34  ;;  %v4037_v7 = vld [vmem:[#allocation7_spill] sm:$0xff] }
 0x318   : > { %v2037_v22 = vmul.f32 0.25, %v4037_v7 }
 0x319   : > { %v1908_v56 = vmul.f32 %v3730_v11, %v3730_v11  ;;  %v1888_v59 = vsel %vm688_vm2, %v3730_v11, 0.0 }
 0x31a   : > { %v1889_v16 = vadd.f32 %v1888_v59, %v1887_v44  ;;  %2596 = vmatmul.msk.f32.gmra.mxu1 %vm472_vm1, %v2037_v22 }
 0x31b   : > { %v1917_v1 = vsel %vm688_vm2, %v1908_v56, 0.0 }
 0x31c   : > { %v1918_v10 = vadd.f32 %v1917_v1, %v1916_v54 }
 0x31e   : > { %v1860_v52 = vpop.f32.mrf.mxu3 }
 0x31f   : > { %v3734_v4 = vadd.f32 %v1860_v52, %v1796_v38  ;;  %v2738_v52 = vmov 64.0  }
 0x320   : > { %2663 = vrcp.f32 %v2738_v52 }
 0x321   : > { %v1909_v41 = vmul.f32 %v3734_v4, %v3734_v4  ;;  %v1890_v42 = vsel %vm688_vm2, %v3734_v4, 0.0 }
 0x322   : > { %v1891_v0 = vadd.f32 %v1890_v42, %v1889_v16 }
 0x323   : > { %v1919_v9 = vsel %vm688_vm2, %v1909_v41, 0.0 }
 0x324   : > { %v1920_v27 = vadd.f32 %v1919_v9, %v1918_v10 }
 0x326   : > { %v1863_v12 = vpop.f32.mrf.mxu3  ;;  %v2664_v5 = vpop.eup %2663 }
 0x327   : > { %v3742_v39 = vadd.f32 %v1863_v12, %v1797_v43  ;;  %v1800_v43 = vadd.f32 %v1790_v60, %v1718_v26  ;;  %v1936_v57 = vmul.f32 64.0, %v2664_v5  ;;  %vm1940_vm0 = vweird.f32 %v2664_v5 }
 0x329   : > { %v1910_v51 = vmul.f32 %v3742_v39, %v3742_v39  ;;  %v1892_v18 = vsel %vm688_vm2, %v3742_v39, 0.0  ;;  %v1937_v2 = vsub.f32 1.0, %v1936_v57 }
 0x32a   : > { %v1893_v15 = vadd.f32 %v1892_v18, %v1891_v0 }
 0x32b   : > { %v1921_v20 = vsel %vm688_vm2, %v1910_v51, 0.0  ;;  %v1938_v41 = vmul.f32 %v2664_v5, %v1937_v2 }
 0x32c   : > { %v1922_v47 = vadd.f32 %v1921_v20, %v1920_v27 }
 0x32d   : > { %v1939_v8 = vadd.f32 %v2664_v5, %v1938_v41 }
 0x32e   : > { %v1866_v48 = vpop.f32.mrf.mxu3 }
 0x32f   : > { %v3764_v24 = vadd.f32 %v1866_v48, %v1798_v62  ;;  %v3788_v16 = vsel %vm1940_vm0, %v2664_v5, %v1939_v8 }
 0x331   : > { %v1894_v29 = vsel %vm688_vm2, %v3764_v24, 0.0  ;;  %v1911_v21 = vmul.f32 %v3764_v24, %v3764_v24 }
 0x332   : > { %v1895_v35 = vadd.f32 %v1894_v29, %v1893_v15 }
 0x333   : > { %v1923_v17 = vsel %vm688_vm2, %v1911_v21, 0.0 }
 0x334   : > { %v1924_v58 = vadd.f32 %v1923_v17, %v1922_v47  ;;  %v1883_v47 = vld [vmem:[%s4017_s5] sm:$0x1] }
 0x336   : > { %v1869_v63 = vpop.f32.mrf.mxu3 }
 0x337   : > { %v3778_v34 = vadd.f32 %v1869_v63, %v1799_v25 }
 0x339   : > { %v1896_v19 = vsel %vm688_vm2, %v3778_v34, 0.0  ;;  %v1912_v23 = vmul.f32 %v3778_v34, %v3778_v34 }
 0x33a   : > { %v1897_v38 = vadd.f32 %v1896_v19, %v1895_v35 }
 0x33b   : > { %v1925_v50 = vsel %vm688_vm2, %v1912_v23, 0.0 }
 0x33c   : > { %v1926_v40 = vadd.f32 %v1925_v50, %v1924_v58 }
 0x33e   : > { %v1872_v53 = vpop.f32.mrf.mxu3 }
 0x33f   : > { %v1882_v49 = vadd.f32 %v1872_v53, %v1800_v43 }
 0x341   : > { %v1898_v12 = vsel %vm688_vm2, %v1882_v49, 0.0  ;;  %v1913_v13 = vmul.f32 %v1882_v49, %v1882_v49 }
 0x342   : > { %v1899_v56 = vadd.f32 %v1898_v12, %v1897_v38 }
 0x343   : > { %v1927_v31 = vsel %vm688_vm2, %v1913_v13, 0.0 }
 0x344   : > { %v1900_v46 = vrot.slane %v1899_v56, 4  ;;  %v1928_v59 = vadd.f32 %v1927_v31, %v1926_v40 }
 0x346   : > { %v1901_v14 = vadd.f32 %v1900_v46, %v1899_v56  ;;  %v1929_v45 = vrot.slane %v1928_v59, 4 }
 0x348   : > { %v1902_v3 = vrot.slane %v1901_v14, 2  ;;  %v1930_v44 = vadd.f32 %v1929_v45, %v1928_v59 }
 0x34a   : > { %v1903_v1 = vadd.f32 %v1902_v3, %v1901_v14  ;;  %v1931_v42 = vrot.slane %v1930_v44, 2  ;;  %v3813_v14 = vpop.f32.mrf.mxu1 }
 0x34c   : > { %v1904_v51 = vrot.slane %v1903_v1, 1  ;;  %v1932_v54 = vadd.f32 %v1931_v42, %v1930_v44  ;;  %v2131_v42 = vmul.f32 %v3813_v14, %v3813_v14 }
 0x34e   : > { %v1905_v62 = vadd.f32 %v1904_v51, %v1903_v1  ;;  %v1933_v9 = vrot.slane %v1932_v54, 1  ;;  %v2110_v1 = vsel %vm2109_vm11, %v3813_v14, 0.0 }
 0x350   : > { %v1934_v18 = vadd.f32 %v1933_v9, %v1932_v54  ;;  %v1942_v61 = vmul.f32 %v3788_v16, %v1905_v62 }
 0x352   : > { %v1943_v10 = vmul.f32 %v3788_v16, %v1934_v18  ;;  %v1944_v0 = vmul.f32 %v1942_v61, %v1942_v61  ;;  %v3815_v45 = vpop.f32.mrf.mxu1  ;;  %v2139_v18 = vsel %vm2109_vm11, %v2131_v42, 0.0 }
 0x353   : > { %v2111_v51 = vsel %vm2109_vm11, %v3815_v45, 0.0  ;;  %v2132_v54 = vmul.f32 %v3815_v45, %v3815_v45 }
 0x354   : > { %v1945_v48 = vsub.f32 %v1943_v10, %v1944_v0  ;;  %v2112_v9 = vadd.f32 %v2111_v51, %v2110_v1 }
 0x356   : > { %v1946_v20 = vadd.f32 1e-05, %v1945_v48 }
 0x358   : > { %2665 = vrsqrt.f32 %v1946_v20  ;;  %vm1953_vm14 = vweird.f32 %v1946_v20 }
 0x35a   : > { %v3817_v3 = vpop.f32.mrf.mxu1 }
 0x35b   : > { %v2113_v10 = vsel %vm2109_vm11, %v3817_v3, 0.0  ;;  %v2133_v0 = vmul.f32 %v3817_v3, %v3817_v3 }
 0x35e   : > { %v2666_v6 = vpop.eup %2665 }
 0x35f   : > { %v1948_v27 = vmul.f32 %v2666_v6, %v1946_v20  ;;  %vm1954_vm1 = vweird.f32 %v2666_v6  ;;  %v2114_v20 = vadd.f32 %v2113_v10, %v2112_v9 }
 0x360   : > { %vm1955_vm15 = vmor %vm1953_vm14, %vm1954_vm1 }
 0x361   : > { %v1949_v15 = vmul.f32 %v2666_v6, %v1948_v27 }
 0x362   : > { %v3819_v44 = vpop.f32.mrf.mxu1 }
 0x363   : > { %v1950_v29 = vmul.f32 0.5, %v1949_v15  ;;  %v2115_v27 = vsel %vm2109_vm11, %v3819_v44, 0.0  ;;  %v2134_v15 = vmul.f32 %v3819_v44, %v3819_v44 }
 0x365   : > { %v1951_v21 = vsub.f32 1.5, %v1950_v29 }
 0x367   : > { %v1952_v35 = vmul.f32 %v2666_v6, %v1951_v21  ;;  %v2116_v21 = vadd.f32 %v2115_v27, %v2114_v20 }
 0x369   : > { %v1956_v7 = vsel %vm1955_vm15, %v2666_v6, %v1952_v35  ;;  %v2142_v6 = vsel %vm2109_vm11, %v2133_v0, 0.0  ;;  %v2144_v35 = vsel %vm2109_vm11, %v2134_v15, 0.0 }
 0x36a   : > { %v1957_v22 = vmul.f32 %v1956_v7, %v1883_v47  ;;  %v3821_v8 = vpop.f32.mrf.mxu1 }
 0x36b   : > { %v2117_v7 = vsel %vm2109_vm11, %v3821_v8, 0.0 }
 0x36c   : > { %v1958_v30 = vmul.f32 %v1957_v22, %v1942_v61  ;;  %v1961_v17 = vperm.slane %v1957_v22, 0  ;;  %v2140_v61 = vsel %vm2109_vm11, %v2132_v54, 0.0  ;;  %v2135_v22 = vmul.f32 %v3821_v8, %v3821_v8 }
 0x36d   : > { %v2141_v48 = vadd.f32 %v2140_v61, %v2139_v18 }
 0x36e   : > { %v1959_v58 = vsub.f32 %v1884_v32, %v1958_v30  ;;  %v1970_v52 = vmul.f32 %v1961_v17, %v1882_v49  ;;  %v1963_v33 = vmul.f32 %v1961_v17, %v3728_v28  ;;  %v1964_v25 = vmul.f32 %v1961_v17, %v3725_v37 }
 0x36f   : > { %v1965_v55 = vmul.f32 %v1961_v17, %v3730_v11  ;;  %v1968_v36 = vmul.f32 %v1961_v17, %v3764_v24  ;;  %v1969_v19 = vmul.f32 %v1961_v17, %v3778_v34  ;;  %v1966_v23 = vmul.f32 %v1961_v17, %v3734_v4 }
 0x370   : > { %v1972_v63 = vperm.slane %v1959_v58, 0  ;;  %v1967_v5 = vmul.f32 %v1961_v17, %v3742_v39  ;;  %v2143_v29 = vadd.f32 %v2142_v6, %v2141_v48  ;;  %v2118_v30 = vadd.f32 %v2117_v7, %v2116_v21 }
 0x371   : > { %v2146_v17 = vsel %vm2109_vm11, %v2135_v22, 0.0 }
 0x372   : > { %v1981_v60 = vadd.f32 %v1972_v63, %v1970_v52  ;;  %v1974_v38 = vadd.f32 %v1972_v63, %v1963_v33  ;;  %v1975_v26 = vadd.f32 %v1972_v63, %v1964_v25  ;;  %v1976_v50 = vadd.f32 %v1972_v63, %v1965_v55  ;;  %v3831_v62 = vpop.f32.mrf.mxu1 }
 0x373   : > { %v1977_v40 = vadd.f32 %v1972_v63, %v1966_v23  ;;  %v1978_v43 = vadd.f32 %v1972_v63, %v1967_v5  ;;  %v1979_v28 = vadd.f32 %v1972_v63, %v1968_v36  ;;  %v1980_v57 = vadd.f32 %v1972_v63, %v1969_v19 }
 0x374   : > { %vm1982_vm3 = vcmp.ge.f32.partialorder %v1974_v38, 0.0  ;;  %v1990_v37 = vmul.f32 0.01, %v1974_v38  ;;  %v1991_v11 = vmul.f32 0.01, %v1975_v26  ;;  %vm1983_vm4 = vcmp.ge.f32.partialorder %v1975_v26, 0.0 }
 0x375   : > { %v1992_v4 = vmul.f32 0.01, %v1976_v50  ;;  %vm1984_vm5 = vcmp.ge.f32.partialorder %v1976_v50, 0.0  ;;  %v1993_v34 = vmul.f32 0.01, %v1977_v40  ;;  %vm1985_vm6 = vcmp.ge.f32.partialorder %v1977_v40, 0.0 }
 0x376   : > { %v1998_v53 = vsel %vm1982_vm3, %v1974_v38, %v1990_v37  ;;  %v1999_v24 = vsel %vm1983_vm4, %v1975_v26, %v1991_v11  ;;  %v1994_v12 = vmul.f32 0.01, %v1978_v43  ;;  %vm1986_vm7 = vcmp.ge.f32.partialorder %v1978_v43, 0.0 }
 0x377   : > { %2597 = vmatmul.msk.f32.vlgmr.msrb.gmra.mxu2 %vm688_vm2, %v1998_v53  ;;  %v2000_v39 = vsel %vm1984_vm5, %v1976_v50, %v1992_v4  ;;  %v2001_v49 = vsel %vm1985_vm6, %v1977_v40, %v1993_v34  ;;  %v1995_v2 = vmul.f32 0.01, %v1979_v28  ;;  %vm1987_vm8 = vcmp.ge.f32.partialorder %v1979_v28, 0.0 }
 0x378   : > { %v2002_v13 = vsel %vm1986_vm7, %v1978_v43, %v1994_v12  ;;  %v1996_v31 = vmul.f32 0.01, %v1980_v57  ;;  %vm1988_vm9 = vcmp.ge.f32.partialorder %v1980_v57, 0.0  ;;  %v1997_v59 = vmul.f32 0.01, %v1981_v60 }
 0x379   : > { %v2003_v56 = vsel %vm1987_vm8, %v1979_v28, %v1995_v2  ;;  %vm1989_vm10 = vcmp.ge.f32.partialorder %v1981_v60, 0.0  ;;  %v2145_v32 = vadd.f32 %v2144_v35, %v2143_v29  ;;  %v2119_v58 = vsel %vm2109_vm11, %v3831_v62, 0.0 }
 0x37a   : > { %v2004_v46 = vsel %vm1988_vm9, %v1980_v57, %v1996_v31  ;;  %v2005_v41 = vsel %vm1989_vm10, %v1981_v60, %v1997_v59  ;;  %v3844_v47 = vpop.f32.mrf.mxu1  ;;  %v2136_v52 = vmul.f32 %v3831_v62, %v3831_v62  ;;  %v2120_v25 = vadd.f32 %v2119_v58, %v2118_v30 }
 0x37b   : > { %v2147_v33 = vadd.f32 %v2146_v17, %v2145_v32  ;;  %v2121_v36 = vsel %vm2109_vm11, %v3844_v47, 0.0  ;;  %v2137_v19 = vmul.f32 %v3844_v47, %v3844_v47 }
 0x37c   : > { %v2148_v55 = vsel %vm2109_vm11, %v2136_v52, 0.0  ;;  %v2122_v60 = vadd.f32 %v2121_v36, %v2120_v25 }
 0x37d   : > { %v2149_v5 = vadd.f32 %v2148_v55, %v2147_v33  ;;  %v2150_v38 = vsel %vm2109_vm11, %v2137_v19, 0.0 }
 0x37f   : > { %2598 = vmatmul.msk.f32.gmra.mxu2 %vm688_vm2, %v1999_v24  ;;  %v2151_v40 = vadd.f32 %v2150_v38, %v2149_v5 }
 0x387   : > { %2599 = vmatmul.msk.f32.gmra.mxu2 %vm688_vm2, %v2000_v39 }
 0x38f   : > { %2600 = vmatmul.msk.f32.gmra.mxu2 %vm688_vm2, %v2001_v49 }
 0x397   : > { %2601 = vmatmul.msk.f32.gmra.mxu2 %vm688_vm2, %v2002_v13  ;;  %v3863_v23 = vpop.f32.mrf.mxu1 }
 0x398   : > { %v2123_v26 = vsel %vm2109_vm11, %v3863_v23, 0.0  ;;  %v2138_v50 = vmul.f32 %v3863_v23, %v3863_v23 }
 0x399   : > { %v2124_v43 = vadd.f32 %v2123_v26, %v2122_v60 }
 0x39a   : > { %v2152_v57 = vsel %vm2109_vm11, %v2138_v50, 0.0 }
 0x39b   : > { %v2125_v37 = vrot.slane %v2124_v43, 4  ;;  %v2153_v53 = vadd.f32 %v2152_v57, %v2151_v40 }
 0x39d   : > { %v2126_v11 = vadd.f32 %v2125_v37, %v2124_v43  ;;  %v2154_v24 = vrot.slane %v2153_v53, 4 }
 0x39f   : > { %2602 = vmatmul.msk.f32.gmra.mxu2 %vm688_vm2, %v2003_v56  ;;  %v2127_v39 = vrot.slane %v2126_v11, 2  ;;  %v2155_v34 = vadd.f32 %v2154_v24, %v2153_v53 }
 0x3a1   : > { %v2128_v49 = vadd.f32 %v2127_v39, %v2126_v11  ;;  %v2156_v12 = vrot.slane %v2155_v34, 2 }
 0x3a3   : > { %v2129_v2 = vrot.slane %v2128_v49, 1  ;;  %v2157_v56 = vadd.f32 %v2156_v12, %v2155_v34 }
 0x3a5   : > { %v2130_v31 = vadd.f32 %v2129_v2, %v2128_v49 }
 0x3a7   : > { %2603 = vmatmul.msk.f32.gmra.mxu2 %vm688_vm2, %v2004_v46  ;;  %v2158_v46 = vrot.slane %v2157_v56, 1  ;;  %v3880_v1 = vmul.f32 %v2130_v31, %v3788_v16 }
 0x3a9   : > { %v2162_v51 = vmul.f32 %v3880_v1, %v3880_v1 }
 0x3af   : > { %2604 = vmatmul.msk.f32.gmra.mxu2 %vm688_vm2, %v2005_v41  ;;  %v2159_v41 = vadd.f32 %v2158_v46, %v2157_v56 }
 0x3b1   : > { %v2161_v42 = vmul.f32 %v2159_v41, %v3788_v16 }
 0x3b3   : > { %v2163_v0 = vsub.f32 %v2161_v42, %v2162_v51 }
 0x3b5   : > { %v2164_v17 = vadd.f32 1e-05, %v2163_v0 }
 0x3b7   : > { %2667 = vrsqrt.f32 %v2164_v17  ;;  %vm2171_vm2 = vweird.f32 %v2164_v17 }
 0x3bd   : > { %v2668_v12 = vpop.eup %2667 }
 0x3be   : > { %v2166_v46 = vmul.f32 %v2668_v12, %v2164_v17  ;;  %vm2172_vm12 = vweird.f32 %v2668_v12 }
 0x3bf   : > { %vm2173_vm13 = vmor %vm2171_vm2, %vm2172_vm12 }
 0x3fa   : > { %v3856_v63 = vpop.f32.mrf.mxu2 }
 0x3fb   : > { %v2289_v18 = vmul.f32 %v3856_v63, %v3856_v63  ;;  %v2268_v48 = vsel %vm2109_vm11, %v3856_v63, 0.0 }
 0x3fd   : > { %v2297_v29 = vsel %vm2109_vm11, %v2289_v18, 0.0  ;;  %v2167_v18 = vmul.f32 %v2668_v12, %v2166_v46 }
 0x402   : > { %v3870_v28 = vpop.f32.mrf.mxu2 }
 0x403   : > { %v2290_v9 = vmul.f32 %v3870_v28, %v3870_v28  ;;  %v2269_v61 = vsel %vm2109_vm11, %v3870_v28, 0.0 }
 0x404   : > { %v2270_v15 = vadd.f32 %v2269_v61, %v2268_v48 }
 0x405   : > { %v2298_v20 = vsel %vm2109_vm11, %v2290_v9, 0.0 }
 0x406   : > { %v2299_v22 = vadd.f32 %v2298_v20, %v2297_v29  ;;  %v2168_v20 = vmul.f32 0.5, %v2167_v18 }
 0x40a   : > { %v3873_v4 = vpop.f32.mrf.mxu2 }
 0x40b   : > { %v2291_v10 = vmul.f32 %v3873_v4, %v3873_v4  ;;  %v2271_v6 = vsel %vm2109_vm11, %v3873_v4, 0.0 }
 0x40c   : > { %v2272_v32 = vadd.f32 %v2271_v6, %v2270_v15 }
 0x40d   : > { %v2300_v21 = vsel %vm2109_vm11, %v2291_v10, 0.0 }
 0x40e   : > { %v2301_v25 = vadd.f32 %v2300_v21, %v2299_v22  ;;  %v2169_v21 = vsub.f32 1.5, %v2168_v20 }
 0x412   : > { %v3875_v13 = vpop.f32.mrf.mxu2 }
 0x413   : > { %v2292_v27 = vmul.f32 %v3875_v13, %v3875_v13  ;;  %v2273_v35 = vsel %vm2109_vm11, %v3875_v13, 0.0 }
 0x414   : > { %v2274_v55 = vadd.f32 %v2273_v35, %v2272_v32  ;;  %v2170_v32 = vmul.f32 %v2668_v12, %v2169_v21 }
 0x415   : > { %v2302_v58 = vsel %vm2109_vm11, %v2292_v27, 0.0 }
 0x416   : > { %v2303_v60 = vadd.f32 %v2302_v58, %v2301_v25 }
 0x41a   : > { %v3877_v59 = vpop.f32.mrf.mxu2 }
 0x41b   : > { %v2293_v7 = vmul.f32 %v3877_v59, %v3877_v59  ;;  %v2275_v52 = vsel %vm2109_vm11, %v3877_v59, 0.0 }
 0x41c   : > { %v2276_v38 = vadd.f32 %v2275_v52, %v2274_v55  ;;  %v2107_v52 = vld [vmem:[%s4023_s11] sm:$0x1] }
 0x41d   : > { %v2304_v36 = vsel %vm2109_vm11, %v2293_v7, 0.0 }
 0x41e   : > { %v2305_v40 = vadd.f32 %v2304_v36, %v2303_v60 }
 0x422   : > { %v3885_v54 = vpop.f32.mrf.mxu2 }
 0x423   : > { %v2294_v33 = vmul.f32 %v3885_v54, %v3885_v54  ;;  %v2277_v19 = vsel %vm2109_vm11, %v3885_v54, 0.0 }
 0x424   : > { %v2278_v43 = vadd.f32 %v2277_v19, %v2276_v38 }
 0x425   : > { %v2306_v26 = vsel %vm2109_vm11, %v2294_v33, 0.0  ;;  %v2174_v33 = vsel %vm2173_vm13, %v2668_v12, %v2170_v32 }
 0x426   : > { %v2307_v37 = vadd.f32 %v2306_v26, %v2305_v40  ;;  %v2175_v25 = vmul.f32 %v2174_v33, %v2107_v52 }
 0x428   : > { %v2176_v19 = vmul.f32 %v2175_v25, %v3880_v1  ;;  %v2179_v38 = vperm.slane %v2175_v25, 0 }
 0x42a   : > { %v3908_v30 = vpop.f32.mrf.mxu2  ;;  %v2182_v1 = vmul.f32 %v2179_v38, %v3815_v45  ;;  %v2187_v12 = vmul.f32 %v2179_v38, %v3844_v47 }
 0x42b   : > { %v2295_v5 = vmul.f32 %v3908_v30, %v3908_v30  ;;  %v2279_v50 = vsel %vm2109_vm11, %v3908_v30, 0.0 }
 0x42c   : > { %v2280_v53 = vadd.f32 %v2279_v50, %v2278_v43  ;;  %v2266_v50 = vld [vmem:[%s4020_s8] sm:$0x1]  ;;  %v2181_v43 = vmul.f32 %v2179_v38, %v3813_v14 }
 0x42d   : > { %v2308_v57 = vsel %vm2109_vm11, %v2295_v5, 0.0  ;;  %v2267_v14 = vld [vmem:[%s4021_s9] sm:$0x1] }
 0x42e   : > { %v2309_v34 = vadd.f32 %v2308_v57, %v2307_v37 }
 0x432   : > { %v3924_v11 = vpop.f32.mrf.mxu2 }
 0x433   : > { %v2281_v24 = vsel %vm2109_vm11, %v3924_v11, 0.0  ;;  %v2296_v39 = vmul.f32 %v3924_v11, %v3924_v11 }
 0x434   : > { %v2282_v49 = vadd.f32 %v2281_v24, %v2280_v53  ;;  %v2183_v53 = vmul.f32 %v2179_v38, %v3817_v3  ;;  %v2184_v24 = vmul.f32 %v2179_v38, %v3819_v44 }
 0x435   : > { %v2310_v2 = vsel %vm2109_vm11, %v2296_v39, 0.0  ;;  %v2185_v39 = vmul.f32 %v2179_v38, %v3821_v8 }
 0x436   : > { %v2283_v56 = vrot.slane %v2282_v49, 4  ;;  %v2311_v31 = vadd.f32 %v2310_v2, %v2309_v34  ;;  %v2188_v2 = vmul.f32 %v2179_v38, %v3863_v23 }
 0x438   : > { %v2284_v41 = vadd.f32 %v2283_v56, %v2282_v49  ;;  %v2312_v42 = vrot.slane %v2311_v31, 4  ;;  %v2186_v49 = vmul.f32 %v2179_v38, %v3831_v62 }
 0x43a   : > { %v2285_v51 = vrot.slane %v2284_v41, 2  ;;  %v2313_v9 = vadd.f32 %v2312_v42, %v2311_v31 }
 0x43c   : > { %v2286_v61 = vadd.f32 %v2285_v51, %v2284_v41  ;;  %v2314_v10 = vrot.slane %v2313_v9, 2 }
 0x43e   : > { %v2287_v0 = vrot.slane %v2286_v61, 1  ;;  %v2315_v48 = vadd.f32 %v2314_v10, %v2313_v9 }
 0x440   : > { %v2288_v6 = vadd.f32 %v2287_v0, %v2286_v61  ;;  %v2316_v27 = vrot.slane %v2315_v48, 1 }
 0x442   : > { %v2317_v15 = vadd.f32 %v2316_v27, %v2315_v48  ;;  %v2318_v29 = vmul.f32 %v2288_v6, %v3788_v16 }
 0x444   : > { %v2319_v35 = vmul.f32 %v2317_v15, %v3788_v16  ;;  %v2320_v7 = vmul.f32 %v2318_v29, %v2318_v29  ;;  %v2108_v16 = vld [vmem:[%s4024_s12] sm:$0x1] }
 0x445   : > { %v2177_v60 = vsub.f32 %v2108_v16, %v2176_v19 }
 0x446   : > { %v2321_v22 = vsub.f32 %v2319_v35, %v2320_v7 }
 0x447   : > { %v2190_v57 = vperm.slane %v2177_v60, 0 }
 0x448   : > { %v2322_v58 = vadd.f32 1e-05, %v2321_v22 }
 0x449   : > { %v2192_v31 = vadd.f32 %v2190_v57, %v2181_v43  ;;  %v2193_v3 = vadd.f32 %v2190_v57, %v2182_v1  ;;  %v2194_v46 = vadd.f32 %v2190_v57, %v2183_v53  ;;  %v2195_v44 = vadd.f32 %v2190_v57, %v2184_v24 }
 0x44a   : > { %2669 = vrsqrt.f32 %v2322_v58  ;;  %vm2329_vm1 = vweird.f32 %v2322_v58  ;;  %v2196_v41 = vadd.f32 %v2190_v57, %v2185_v39  ;;  %v2197_v42 = vadd.f32 %v2190_v57, %v2186_v49 }
 0x44b   : > { %v2198_v51 = vadd.f32 %v2190_v57, %v2187_v12  ;;  %v2199_v62 = vadd.f32 %v2190_v57, %v2188_v2 }
 0x450   : > { %v2670_v55 = vpop.eup %2669 }
 0x451   : > { %v2324_v36 = vmul.f32 %v2670_v55, %v2322_v58  ;;  %vm2330_vm0 = vweird.f32 %v2670_v55 }
 0x452   : > { %vm2331_vm14 = vmor %vm2329_vm1, %vm2330_vm0 }
 0x453   : > { %v2325_v5 = vmul.f32 %v2670_v55, %v2324_v36 }
 0x455   : > { %v2326_v17 = vmul.f32 0.5, %v2325_v5 }
 0x457   : > { %v2327_v26 = vsub.f32 1.5, %v2326_v17 }
 0x459   : > { %v2328_v40 = vmul.f32 %v2670_v55, %v2327_v26 }
 0x45b   : > { %v2332_v37 = vsel %vm2331_vm14, %v2670_v55, %v2328_v40 }
 0x45c   : > { %v2333_v34 = vmul.f32 %v2332_v37, %v2266_v50 }
 0x45e   : > { %v2334_v45 = vmul.f32 %v2333_v34, %v2318_v29  ;;  %v2337_v56 = vperm.slane %v2333_v34, 0 }
 0x460   : > { %v2335_v8 = vsub.f32 %v2267_v14, %v2334_v45  ;;  %v2339_v47 = vmul.f32 %v2337_v56, %v3856_v63  ;;  %v2340_v23 = vmul.f32 %v2337_v56, %v3870_v28  ;;  %v2341_v9 = vmul.f32 %v2337_v56, %v3873_v4 }
 0x461   : > { %v2342_v18 = vmul.f32 %v2337_v56, %v3875_v13  ;;  %v2343_v10 = vmul.f32 %v2337_v56, %v3877_v59  ;;  %v2344_v0 = vmul.f32 %v2337_v56, %v3885_v54  ;;  %v2345_v48 = vmul.f32 %v2337_v56, %v3908_v30 }
 0x462   : > { %v2348_v61 = vperm.slane %v2335_v8, 0  ;;  %v2346_v20 = vmul.f32 %v2337_v56, %v3924_v11 }
 0x464   : > { %v2350_v6 = vadd.f32 %v2348_v61, %v2339_v47  ;;  %v2351_v63 = vadd.f32 %v2348_v61, %v2340_v23  ;;  %v2352_v27 = vadd.f32 %v2348_v61, %v2341_v9  ;;  %v2353_v28 = vadd.f32 %v2348_v61, %v2342_v18 }
 0x465   : > { %v2354_v15 = vadd.f32 %v2348_v61, %v2343_v10  ;;  %v2355_v4 = vadd.f32 %v2348_v61, %v2344_v0  ;;  %v2356_v29 = vadd.f32 %v2348_v61, %v2345_v48  ;;  %v2357_v21 = vadd.f32 %v2348_v61, %v2346_v20 }
 0x466   : > { %v2358_v13 = vadd.f32 %v2350_v6, %v2192_v31  ;;  %v2359_v35 = vadd.f32 %v2351_v63, %v2193_v3  ;;  %v2360_v59 = vadd.f32 %v2352_v27, %v2194_v46  ;;  %v2361_v7 = vadd.f32 %v2353_v28, %v2195_v44 }
 0x467   : > { %v2365_v54 = vadd.f32 %v2357_v21, %v2199_v62  ;;  %v2362_v22 = vadd.f32 %v2354_v15, %v2196_v41  ;;  %v2363_v30 = vadd.f32 %v2355_v4, %v2197_v42  ;;  %v2364_v11 = vadd.f32 %v2356_v29, %v2198_v51 }
 0x468   : > { %vm2366_vm15 = vcmp.ge.f32.partialorder %v2358_v13, 0.0  ;;  %vm2367_vm3 = vcmp.ge.f32.partialorder %v2359_v35, 0.0  ;;  %vm2368_vm5 = vcmp.ge.f32.partialorder %v2360_v59, 0.0  ;;  %vm2369_vm6 = vcmp.ge.f32.partialorder %v2361_v7, 0.0 }
 0x469   : > { %vm2373_vm4 = vcmp.ge.f32.partialorder %v2365_v54, 0.0  ;;  %v2381_v32 = vmul.f32 0.01, %v2365_v54  ;;  %vm2370_vm7 = vcmp.ge.f32.partialorder %v2362_v22, 0.0  ;;  %vm2371_vm8 = vcmp.ge.f32.partialorder %v2363_v30, 0.0 }
 0x46a   : > { %v2374_v58 = vmul.f32 0.01, %v2358_v13  ;;  %v2375_v52 = vmul.f32 0.01, %v2359_v35  ;;  %v2376_v25 = vmul.f32 0.01, %v2360_v59 }
 0x46b   : > { %v2389_v33 = vsel %vm2373_vm4, %v2365_v54, %v2381_v32  ;;  %v2377_v55 = vmul.f32 0.01, %v2361_v7  ;;  %v2378_v36 = vmul.f32 0.01, %v2362_v22  ;;  %v2379_v19 = vmul.f32 0.01, %v2363_v30 }
 0x46c   : > { %2397 = vst.msk [vmem:[%s433_s29 + $0x38] sm:$0xff] %vm2109_vm11, %v2389_v33  ;;  %v2380_v5 = vmul.f32 0.01, %v2364_v11  ;;  %v2382_v16 = vsel %vm2366_vm15, %v2358_v13, %v2374_v58  ;;  %v2383_v17 = vsel %vm2367_vm3, %v2359_v35, %v2375_v52  ;;  %vm2372_vm9 = vcmp.ge.f32.partialorder %v2364_v11, 0.0 }
 0x46d   : > { %v2384_v60 = vsel %vm2368_vm5, %v2360_v59, %v2376_v25  ;;  %v2385_v38 = vsel %vm2369_vm6, %v2361_v7, %v2377_v55  ;;  %2390 = vst.msk [vmem:[%s433_s29] sm:$0xff] %vm2109_vm11, %v2382_v16  ;;  %v2386_v26 = vsel %vm2370_vm7, %v2362_v22, %v2378_v36  ;;  %v2387_v50 = vsel %vm2371_vm8, %v2363_v30, %v2379_v19 }
 0x46e   : > { %2391 = vst.msk [vmem:[%s433_s29 + $0x8] sm:$0xff] %vm2109_vm11, %v2383_v17  ;;  %v2388_v40 = vsel %vm2372_vm9, %v2364_v11, %v2380_v5 }
 0x46f   : > { %2392 = vst.msk [vmem:[%s433_s29 + $0x10] sm:$0xff] %vm2109_vm11, %v2384_v60 }
 0x470   : > { %2393 = vst.msk [vmem:[%s433_s29 + $0x18] sm:$0xff] %vm2109_vm11, %v2385_v38 }
 0x471   : > { %2394 = vst.msk [vmem:[%s433_s29 + $0x20] sm:$0xff] %vm2109_vm11, %v2386_v26 }
 0x472   : > { %2395 = vst.msk [vmem:[%s433_s29 + $0x28] sm:$0xff] %vm2109_vm11, %v2387_v50 }
 0x473   : > { %2396 = vst.msk [vmem:[%s433_s29 + $0x30] sm:$0xff] %vm2109_vm11, %v2388_v40 }
 0x474   : > { %2699 = shalt.err (!%p2696_p3)
}
 0x475   : > { %s2739_s20 = smov 128   ;;  %s2740_s29 = smov 8  }
 0x476   : > { %2615 = dma.vmem_to_hbm [thread:$0]  (%p2849_p5), %s2412_s30, 1024, %s2414_s16, %s2399_s21, %s2739_s20, %s2739_s20, %s2740_s29  }
 0x477 PF: > { %p2621_p4 = scmp.ge.s32.totalorder %s2734_s28, 2  ;;  %s2428_s23 = sand.u32 1, %s2722_s25  }
 0x478   : > { %s2429_s1 = scalar_lea.sflag [#allocation4], %s2428_s23 }
 0x479   : > { %p2618_p7 = pnand %p2621_p4, %p2853_p6 }
 0x47b   : > { %p2619_p8 = pneg %p2618_p7 }
 0x47d   : > { %2717 = dma.done.wait (%p2619_p8), %s2429_s1, 1024  }
 0x47e   : > { %2719 = vsyncadd (%p2619_p8), %s2429_s1, 4294966272  ;;  %p23_p9 = scmp.ge.s32.totalorder %s2836_s14, 4   ;;  %s4038_s25 = smov %s2726_s26 }
 0x47f   : > { %s4039_s26 = smov %s2730_s27  ;;  %s4040_s27 = smov %s2847_s17 }
 0x480   : > { %s4041_s28 = smov %s2836_s14  ;;  %25 = sbr.rel (!%p23_p9) target bundleno = 7 (0x7), region = 113 }
 0x485   :  { %2435 = vsyncpa [#allocation4], 1 }
 0x486   :  { %2437 = vsyncpa [#allocation4 + $0x1], 1 }

</bundles_post_ra>
